<compile_context>
chip_gen: v5e
topology: v5e:2x2
jax: 0.10.0
libtpu: 0.0.40
codegen_flags: <defaults>
</compile_context>

<pallas_src>
import math
import functools

import jax
import jax.numpy as jnp
from jax.experimental import pallas as pl
from jax.experimental.pallas import tpu as pltpu


# --------------------------------------------------------------------------
# Kernel helpers
# --------------------------------------------------------------------------
def _layer_norm(z, gb, eps=1e-5):
    # gb: (2, E) -> gamma = gb[0:1], beta = gb[1:2]; z: (M, E) f32
    g = gb[0:1, :]
    b = gb[1:2, :]
    mu = jnp.mean(z, axis=-1, keepdims=True)
    var = jnp.mean((z - mu) ** 2, axis=-1, keepdims=True)
    return (z - mu) * jax.lax.rsqrt(var + eps) * g + b


# --------------------------------------------------------------------------
# Fused kernel: one grid step = (batch block, one encoder layer)
# --------------------------------------------------------------------------
def fused_forward_kernel(xp_ref, pw_ref, pb_ref, pe_ref,
                         wqkv_ref, bqkv_ref, wo_ref, bo_ref, ln1_ref,
                         w1_ref, b1_ref, w2_ref, b2_ref, ln2_ref,
                         lnf_ref, cw_ref, cb_ref,
                         o_ref, t_scratch, *, heads, use_activation):
    layer = pl.program_id(1)
    n_layers = pl.num_programs(1)

    B, L, PC = xp_ref.shape          # batch block, tokens per seq, patch*channels
    E = pw_ref.shape[1]
    dh = E // heads
    M = B * L
    bf16 = jnp.bfloat16
    f32 = jnp.float32

    # ---- first layer step of this batch block: patch embed + positional enc ----
    @pl.when(layer == 0)
    def _():
        x2 = xp_ref[...].reshape(M, PC)
        t2 = jnp.dot(x2.astype(bf16), pw_ref[...],
                     preferred_element_type=f32) + pb_ref[...]
        t3 = t2.reshape(B, L, E) + pe_ref[...]            # PE broadcast over batch
        t_scratch[...] = t3.reshape(M, E)                 # dropout = identity (eval)

    # ---- encoder layer `layer` (this layer's weights streamed into VMEM) ----
    t = t_scratch[...]                                    # (M, E) f32

    # fused QKV projection: one (M,E)@(E,3E) matmul, 1/sqrt(dh) folded into Wq/bq
    qkv = jnp.dot(t.astype(bf16), wqkv_ref[0],
                  preferred_element_type=f32) + bqkv_ref[0]        # (M, 3E)
    q3 = qkv[:, :E].reshape(B, L, E)
    k3 = qkv[:, E:2 * E].reshape(B, L, E)
    v3 = qkv[:, 2 * E:].reshape(B, L, E)

    # head-batched attention: build (heads*B, L, dh) by leading-axis concat,
    # then two batched einsums (instead of `heads` small matmuls per layer).
    def to_gbatch(z3):
        return jnp.concatenate(
            [z3[:, :, h * dh:(h + 1) * dh] for h in range(heads)], axis=0)

    qg = to_gbatch(q3).astype(bf16)
    kg = to_gbatch(k3).astype(bf16)
    vg = to_gbatch(v3).astype(bf16)

    s = jnp.einsum('gqd,gkd->gqk', qg, kg, preferred_element_type=f32)
    s = s - jnp.max(s, axis=-1, keepdims=True)
    p = jnp.exp(s)
    p = p * pl.reciprocal(jnp.sum(p, axis=-1, keepdims=True), approx=True)
    og = jnp.einsum('gqk,gkd->gqd', p.astype(bf16), vg,
                    preferred_element_type=f32)                    # (heads*B, L, dh)

    attn = jnp.concatenate([og[h * B:(h + 1) * B] for h in range(heads)],
                           axis=-1)                                # (B, L, E)
    attn = attn.reshape(M, E)
    attn = jnp.dot(attn.astype(bf16), wo_ref[0],
                   preferred_element_type=f32) + bo_ref[0]

    # post-LN: LN(x + MHA(x)) then LN(h + FFN(h)); LN math stays f32
    h1 = _layer_norm(t + attn, ln1_ref[0])
    ff = jnp.dot(h1.astype(bf16), w1_ref[0],
                 preferred_element_type=f32) + b1_ref[0]
    ff = jnp.maximum(ff, 0.0)                                      # ReLU
    ff = jnp.dot(ff.astype(bf16), w2_ref[0],
                 preferred_element_type=f32) + b2_ref[0]
    t_new = _layer_norm(h1 + ff, ln2_ref[0])
    t_scratch[...] = t_new                                         # carry to next layer

    # ---- last layer step: final LN + classifier (lane-padded) + optional ReLU ----
    @pl.when(layer == n_layers - 1)
    def _():
        tf = _layer_norm(t_new, lnf_ref[...])
        y = jnp.dot(tf.astype(bf16), cw_ref[...],
                    preferred_element_type=f32) + cb_ref[...]
        if use_activation:
            y = jnp.maximum(y, 0.0)
        o_ref[...] = y.reshape(B, L, cw_ref.shape[1])              # lane-dense store


# --------------------------------------------------------------------------
# Wrapper
# --------------------------------------------------------------------------
def residual_transformer_forward(x, kparams, *, heads, patch_size, num_class,
                                 use_activation=True, batch_block=None):
    bs, seq_len, c = x.shape
    l_e = seq_len // patch_size
    pc = patch_size * c
    E = kparams["patch_w"].shape[1]
    n_layers = kparams["wqkv"].shape[0]
    hid = kparams["w1"].shape[2]
    C_pad = kparams["cls_w"].shape[1]

    # Batch blocking: fold batch into the matmul M dimension.  For real sizes
    # pick batch_block so batch_block*l_e >= 256 (and even #blocks on v7x).
    if batch_block is None:
        batch_block = bs
    assert bs % batch_block == 0, "bs must be divisible by batch_block"
    n_bblk = bs // batch_block

    # PatchTokenizer glue: group `patch_size` consecutive timesteps.
    xp = x.reshape(bs, l_e, pc).astype(jnp.float32)

    in_specs = [
        pl.BlockSpec((batch_block, l_e, pc), lambda b, l: (b, 0, 0)),   # xp
        pl.BlockSpec((pc, E), lambda b, l: (0, 0)),                     # patch_w (bf16)
        pl.BlockSpec((1, E), lambda b, l: (0, 0)),                      # patch_b
        pl.BlockSpec((l_e, E), lambda b, l: (0, 0)),                    # pe
        pl.BlockSpec((1, E, 3 * E), lambda b, l: (l, 0, 0)),            # wqkv (streamed)
        pl.BlockSpec((1, 1, 3 * E), lambda b, l: (l, 0, 0)),            # bqkv
        pl.BlockSpec((1, E, E), lambda b, l: (l, 0, 0)),                # wo
        pl.BlockSpec((1, 1, E), lambda b, l: (l, 0, 0)),                # bo
        pl.BlockSpec((1, 2, E), lambda b, l: (l, 0, 0)),                # ln1
        pl.BlockSpec((1, E, hid), lambda b, l: (l, 0, 0)),              # w1
        pl.BlockSpec((1, 1, hid), lambda b, l: (l, 0, 0)),              # b1
        pl.BlockSpec((1, hid, E), lambda b, l: (l, 0, 0)),              # w2
        pl.BlockSpec((1, 1, E), lambda b, l: (l, 0, 0)),                # b2
        pl.BlockSpec((1, 2, E), lambda b, l: (l, 0, 0)),                # ln2
        pl.BlockSpec((2, E), lambda b, l: (0, 0)),                      # lnf
        pl.BlockSpec((E, C_pad), lambda b, l: (0, 0)),                  # cls_w (padded)
        pl.BlockSpec((1, C_pad), lambda b, l: (0, 0)),                  # cls_b (padded)
    ]
    out_spec = pl.BlockSpec((batch_block, l_e, C_pad), lambda b, l: (b, 0, 0))

    args = (xp, kparams["patch_w"], kparams["patch_b"], kparams["pe"],
            kparams["wqkv"], kparams["bqkv"], kparams["wo"], kparams["bo"],
            kparams["ln1"], kparams["w1"], kparams["b1"], kparams["w2"],
            kparams["b2"], kparams["ln2"], kparams["lnf"],
            kparams["cls_w"], kparams["cls_b"])

    # Size the scoped VMEM limit from the actual block footprint (+headroom).
    def _bytes(shape, dt):
        return int(math.prod(shape)) * jnp.dtype(dt).itemsize
    blk_bytes = sum(_bytes(s.block_shape, a.dtype) for s, a in zip(in_specs, args))
    blk_bytes += _bytes(out_spec.block_shape, jnp.float32)
    scratch_bytes = _bytes((batch_block * l_e, E), jnp.float32)
    vmem_limit = 2 * blk_bytes + scratch_bytes + (8 << 20)    # 2x = double buffering
    vmem_limit = int(min(max(vmem_limit, 32 << 20), 120 << 20))

    out_pad = pl.pallas_call(
        functools.partial(fused_forward_kernel, heads=heads,
                          use_activation=use_activation),
        out_shape=jax.ShapeDtypeStruct((bs, l_e, C_pad), jnp.float32),
        grid=(n_bblk, n_layers),
        in_specs=in_specs,
        out_specs=out_spec,
        scratch_shapes=[pltpu.VMEM((batch_block * l_e, E), jnp.float32)],
        compiler_params=pltpu.CompilerParams(
            dimension_semantics=("parallel", "arbitrary"),
            vmem_limit_bytes=vmem_limit),
    )(*args)

    # Classifier was applied pre-upsample inside the kernel (commutes with the
    # nearest-neighbour repeat): slice off lane padding, then repeat to seq_len.
    y = out_pad[:, :, :num_class]
    y = jnp.repeat(y, patch_size, axis=1)                     # (bs, seq_len, num_class)
    return y


# --------------------------------------------------------------------------
# Pure-JAX reference (matches original module ordering exactly, f32)
# --------------------------------------------------------------------------
def reference_forward(x, params, *, heads, patch_size, use_activation=True):
    bs, seq_len, c = x.shape
    l_e = seq_len // patch_size
    E = params["patch_w"].shape[1]
    dh = E // heads
    n_layers = params["wqkv"].shape[0]

    def ln(z, gb):
        mu = jnp.mean(z, -1, keepdims=True)
        var = jnp.mean((z - mu) ** 2, -1, keepdims=True)
        return (z - mu) * jax.lax.rsqrt(var + 1e-5) * gb[0] + gb[1]

    t = x.reshape(bs, l_e, patch_size * c) @ params["patch_w"] + params["patch_b"]
    t = t + params["pe"][None]
    for i in range(n_layers):
        qkv = t @ params["wqkv"][i] + params["bqkv"][i]
        q, k, v = qkv[..., :E], qkv[..., E:2 * E], qkv[..., 2 * E:]
        q = q.reshape(bs, l_e, heads, dh)
        k = k.reshape(bs, l_e, heads, dh)
        v = v.reshape(bs, l_e, heads, dh)
        s = jnp.einsum("bqhd,bkhd->bhqk", q, k) / math.sqrt(dh)
        p = jax.nn.softmax(s, axis=-1)
        o = jnp.einsum("bhqk,bkhd->bqhd", p, v).reshape(bs, l_e, E)
        o = o @ params["wo"][i] + params["bo"][i]
        h1 = ln(t + o, params["ln1"][i])
        ff = jnp.maximum(h1 @ params["w1"][i] + params["b1"][i], 0.0)
        ff = ff @ params["w2"][i] + params["b2"][i]
        t = ln(h1 + ff, params["ln2"][i])
    t = ln(t, params["lnf"])
    up = jnp.repeat(t, patch_size, axis=1)                    # upsample then classifier
    y = up @ params["cls_w"] + params["cls_b"]
    if use_activation:
        y = jnp.maximum(y, 0.0)
    return y


# --------------------------------------------------------------------------
# Parameter init (f32 reference params) + one-time kernel-param preparation
# --------------------------------------------------------------------------
def make_params(key, *, input_size, emb_dim, heads, expansion, n_layers,
                patch_size, l_e, num_class):
    E = emb_dim // heads * heads
    if E < heads:
        E = heads
    hid = E * expansion
    pc = patch_size * input_size

    def nrm(k, shape, scale=0.05):
        return (scale * jax.random.normal(k, shape)).astype(jnp.float32)

    keys = jax.random.split(key, 12)
    ki = iter(keys)

    # Fixed sinusoidal positional encoding (scale_factor = 1.0)
    pos = jnp.arange(l_e, dtype=jnp.float32)[:, None]
    div = jnp.exp(jnp.arange(0, E, 2, dtype=jnp.float32) * (-math.log(10000.0) / E))
    pe = jnp.zeros((l_e, E), jnp.float32)
    pe = pe.at[:, 0::2].set(jnp.sin(pos * div))
    pe = pe.at[:, 1::2].set(jnp.cos(pos * div))

    ln_stack = jnp.stack([jnp.ones((n_layers, E), jnp.float32),
                          jnp.zeros((n_layers, E), jnp.float32)], axis=1)
    lnf = jnp.stack([jnp.ones((E,), jnp.float32),
                     jnp.zeros((E,), jnp.float32)], axis=0)        # (2, E)

    params = {
        "patch_w": nrm(next(ki), (pc, E)),
        "patch_b": nrm(next(ki), (1, E)),
        "pe": pe,
        "wqkv": nrm(next(ki), (n_layers, E, 3 * E)),
        "bqkv": nrm(next(ki), (n_layers, 1, 3 * E)),
        "wo": nrm(next(ki), (n_layers, E, E)),
        "bo": nrm(next(ki), (n_layers, 1, E)),
        "ln1": ln_stack,
        "w1": nrm(next(ki), (n_layers, E, hid)),
        "b1": nrm(next(ki), (n_layers, 1, hid)),
        "w2": nrm(next(ki), (n_layers, hid, E)),
        "b2": nrm(next(ki), (n_layers, 1, E)),
        "ln2": ln_stack,
        "lnf": lnf,
        "cls_w": nrm(next(ki), (E, num_class)),
        "cls_b": nrm(next(ki), (1, num_class)),
    }
    return params, E


def prepare_kernel_params(params, *, heads, num_class, lane_pad=128):
    """One-time transform: fold 1/sqrt(dh) into Wq/bq, cast MXU weights to bf16,
    lane-pad the classifier to 128 columns.  Biases / LN params / PE stay f32."""
    E = params["patch_w"].shape[1]
    dh = E // heads
    scale = 1.0 / math.sqrt(dh)
    col_scale = jnp.concatenate([jnp.full((E,), scale, jnp.float32),
                                 jnp.ones((2 * E,), jnp.float32)])
    wqkv = params["wqkv"] * col_scale        # scale Q columns only
    bqkv = params["bqkv"] * col_scale

    C_pad = max(lane_pad, num_class)
    cls_w_pad = jnp.zeros((E, C_pad), jnp.float32).at[:, :num_class].set(params["cls_w"])
    cls_b_pad = jnp.zeros((1, C_pad), jnp.float32).at[:, :num_class].set(params["cls_b"])

    bf = jnp.bfloat16
    return {
        "patch_w": params["patch_w"].astype(bf),
        "patch_b": params["patch_b"],
        "pe": params["pe"],
        "wqkv": wqkv.astype(bf),
        "bqkv": bqkv,
        "wo": params["wo"].astype(bf),
        "bo": params["bo"],
        "ln1": params["ln1"],
        "w1": params["w1"].astype(bf),
        "b1": params["b1"],
        "w2": params["w2"].astype(bf),
        "b2": params["b2"],
        "ln2": params["ln2"],
        "lnf": params["lnf"],
        "cls_w": cls_w_pad.astype(bf),
        "cls_b": cls_b_pad,
    }


if __name__ == "__main__":
    # Small config consistent with the module's forward
    bs, seq_len, input_size = 2, 16, 4
    heads, emb_dim, expansion, n_layers = 4, 32, 4, 2
    patch_size, num_class = 2, 2
    l_e = seq_len // patch_size

    key = jax.random.PRNGKey(0)
    k_x, k_p = jax.random.split(key)
    x = jax.random.normal(k_x, (bs, seq_len, input_size), jnp.float32)

    params, E = make_params(k_p, input_size=input_size, emb_dim=emb_dim,
                            heads=heads, expansion=expansion, n_layers=n_layers,
                            patch_size=patch_size, l_e=l_e, num_class=num_class)
    kparams = prepare_kernel_params(params, heads=heads, num_class=num_class)

    out = residual_transformer_forward(x, kparams, heads=heads,
                                       patch_size=patch_size,
                                       num_class=num_class,
                                       use_activation=True,
                                       batch_block=bs)
    out = jax.block_until_ready(out)

    ref = reference_forward(x, params, heads=heads, patch_size=patch_size,
                            use_activation=True)
    assert out.shape == (bs, seq_len, num_class)
    # Relaxed tolerance: bf16 MXU inputs (f32 accumulation) + EUP approximate
    # reciprocal in the softmax; reference runs fully in f32.
    assert jnp.allclose(out, ref, atol=2e-2, rtol=2e-2), "mismatch vs reference"

    print("KERNEL_OK")
</pallas_src>

<mosaic_0001>
module attributes {stable_mosaic.version = 11 : i64} {
  func.func @fused_forward_kernel(%arg0: i32, %arg1: i32, %arg2: memref<2x8x8xf32, #tpu.memory_space<vmem>>, %arg3: memref<8x32xbf16, #tpu.memory_space<vmem>>, %arg4: memref<1x32xf32, #tpu.memory_space<vmem>>, %arg5: memref<8x32xf32, #tpu.memory_space<vmem>>, %arg6: memref<1x32x96xbf16, #tpu.memory_space<vmem>>, %arg7: memref<1x1x96xf32, #tpu.memory_space<vmem>>, %arg8: memref<1x32x32xbf16, #tpu.memory_space<vmem>>, %arg9: memref<1x1x32xf32, #tpu.memory_space<vmem>>, %arg10: memref<1x2x32xf32, #tpu.memory_space<vmem>>, %arg11: memref<1x32x128xbf16, #tpu.memory_space<vmem>>, %arg12: memref<1x1x128xf32, #tpu.memory_space<vmem>>, %arg13: memref<1x128x32xbf16, #tpu.memory_space<vmem>>, %arg14: memref<1x1x32xf32, #tpu.memory_space<vmem>>, %arg15: memref<1x2x32xf32, #tpu.memory_space<vmem>>, %arg16: memref<2x32xf32, #tpu.memory_space<vmem>>, %arg17: memref<32x128xbf16, #tpu.memory_space<vmem>>, %arg18: memref<1x128xf32, #tpu.memory_space<vmem>>, %arg19: memref<2x8x128xf32, #tpu.memory_space<vmem>>, %arg20: memref<16x32xf32, #tpu.memory_space<vmem>>) attributes {dimension_semantics = [#tpu.dimension_semantics<parallel>, #tpu.dimension_semantics<arbitrary>], iteration_bounds = array<i64: 1, 2>, scalar_prefetch = 0 : i64, scratch_operands = 1 : i64, tpu.core_type = #tpu.core_type<tc>, window_params = [{transform_indices = @transform_0, window_bounds = array<i64: 2, 8, 8>}, {pipeline_mode = #tpu.pipeline_mode<synchronous>, transform_indices = @transform_1, window_bounds = array<i64: 8, 32>}, {pipeline_mode = #tpu.pipeline_mode<synchronous>, transform_indices = @transform_2, window_bounds = array<i64: 1, 32>}, {pipeline_mode = #tpu.pipeline_mode<synchronous>, transform_indices = @transform_3, window_bounds = array<i64: 8, 32>}, {transform_indices = @transform_4, window_bounds = array<i64: 1, 32, 96>}, {transform_indices = @transform_5, window_bounds = array<i64: 1, 1, 96>}, {transform_indices = @transform_6, window_bounds = array<i64: 1, 32, 32>}, {transform_indices = @transform_7, window_bounds = array<i64: 1, 1, 32>}, {transform_indices = @transform_8, window_bounds = array<i64: 1, 2, 32>}, {transform_indices = @transform_9, window_bounds = array<i64: 1, 32, 128>}, {transform_indices = @transform_10, window_bounds = array<i64: 1, 1, 128>}, {transform_indices = @transform_11, window_bounds = array<i64: 1, 128, 32>}, {transform_indices = @transform_12, window_bounds = array<i64: 1, 1, 32>}, {transform_indices = @transform_13, window_bounds = array<i64: 1, 2, 32>}, {pipeline_mode = #tpu.pipeline_mode<synchronous>, transform_indices = @transform_14, window_bounds = array<i64: 2, 32>}, {pipeline_mode = #tpu.pipeline_mode<synchronous>, transform_indices = @transform_15, window_bounds = array<i64: 32, 128>}, {pipeline_mode = #tpu.pipeline_mode<synchronous>, transform_indices = @transform_16, window_bounds = array<i64: 1, 128>}, {transform_indices = @transform_17, window_bounds = array<i64: 2, 8, 128>}]} {
    %c0_i32 = arith.constant 0 : i32
    %0 = arith.cmpi eq, %arg1, %c0_i32 : i32
    %1 = arith.extui %0 : i1 to i32
    %c0_i32_0 = arith.constant 0 : i32
    %2 = arith.cmpi ne, %1, %c0_i32_0 : i32
    scf.if %2 {
      %c0_53 = arith.constant 0 : index
      %c0_54 = arith.constant 0 : index
      %c0_55 = arith.constant 0 : index
      %139 = vector.load %arg2[%c0_53, %c0_54, %c0_55] : memref<2x8x8xf32, #tpu.memory_space<vmem>>, vector<2x8x8xf32>
      %140 = vector.shape_cast %139 : vector<2x8x8xf32> to vector<16x8xf32>
      %141 = arith.truncf %140 : vector<16x8xf32> to vector<16x8xbf16>
      %c0_56 = arith.constant 0 : index
      %c0_57 = arith.constant 0 : index
      %142 = vector.load %arg3[%c0_56, %c0_57] : memref<8x32xbf16, #tpu.memory_space<vmem>>, vector<8x32xbf16>
      %cst_58 = arith.constant dense<0.000000e+00> : vector<16x32xf32>
      %143 = tpu.matmul %141, %142, %cst_58 {dimension_numbers = #tpu.dot_dimension_numbers<[1], [0], [0], [1], [0, 0, 1, 1], [], []>} : vector<16x8xbf16>, vector<8x32xbf16>, vector<16x32xf32> -> vector<16x32xf32>
      %c0_59 = arith.constant 0 : index
      %c0_60 = arith.constant 0 : index
      %144 = vector.load %arg4[%c0_59, %c0_60] : memref<1x32xf32, #tpu.memory_space<vmem>>, vector<1x32xf32>
      %145 = vector.broadcast %144 : vector<1x32xf32> to vector<16x32xf32>
      %146 = arith.addf %143, %145 : vector<16x32xf32>
      %147 = vector.shape_cast %146 : vector<16x32xf32> to vector<2x8x32xf32>
      %c0_61 = arith.constant 0 : index
      %c0_62 = arith.constant 0 : index
      %148 = vector.load %arg5[%c0_61, %c0_62] : memref<8x32xf32, #tpu.memory_space<vmem>>, vector<8x32xf32>
      %149 = vector.shape_cast %148 : vector<8x32xf32> to vector<1x8x32xf32>
      %150 = vector.broadcast %149 : vector<1x8x32xf32> to vector<2x8x32xf32>
      %151 = arith.addf %147, %150 : vector<2x8x32xf32>
      %152 = vector.shape_cast %151 : vector<2x8x32xf32> to vector<16x32xf32>
      %c0_63 = arith.constant 0 : index
      %c0_64 = arith.constant 0 : index
      %153 = vector.load %arg20[%c0_63, %c0_64] : memref<16x32xf32, #tpu.memory_space<vmem>>, vector<16x32xf32>
      tpu.vector_store %arg20[%c0_63, %c0_64], %152 {strides = array<i32>} : memref<16x32xf32, #tpu.memory_space<vmem>>, vector<16x32xf32>,
    } else {
    }
    %c0 = arith.constant 0 : index
    %c0_1 = arith.constant 0 : index
    %3 = vector.load %arg20[%c0, %c0_1] : memref<16x32xf32, #tpu.memory_space<vmem>>, vector<16x32xf32>
    %4 = arith.truncf %3 : vector<16x32xf32> to vector<16x32xbf16>
    %c0_2 = arith.constant 0 : index
    %c0_3 = arith.constant 0 : index
    %c0_4 = arith.constant 0 : index
    %5 = vector.load %arg6[%c0_2, %c0_3, %c0_4] : memref<1x32x96xbf16, #tpu.memory_space<vmem>>, vector<1x32x96xbf16>
    %6 = vector.shape_cast %5 : vector<1x32x96xbf16> to vector<32x96xbf16>
    %cst = arith.constant dense<0.000000e+00> : vector<16x96xf32>
    %7 = tpu.matmul %4, %6, %cst {dimension_numbers = #tpu.dot_dimension_numbers<[1], [0], [0], [1], [0, 0, 1, 1], [], []>} : vector<16x32xbf16>, vector<32x96xbf16>, vector<16x96xf32> -> vector<16x96xf32>
    %c0_5 = arith.constant 0 : index
    %c0_6 = arith.constant 0 : index
    %c0_7 = arith.constant 0 : index
    %8 = vector.load %arg7[%c0_5, %c0_6, %c0_7] : memref<1x1x96xf32, #tpu.memory_space<vmem>>, vector<1x1x96xf32>
    %9 = vector.shape_cast %8 : vector<1x1x96xf32> to vector<1x96xf32>
    %10 = vector.broadcast %9 : vector<1x96xf32> to vector<16x96xf32>
    %11 = arith.addf %7, %10 : vector<16x96xf32>
    %12 = vector.extract_strided_slice %11 {offsets = [0, 0], sizes = [16, 32], strides = [1, 1]} : vector<16x96xf32> to vector<16x32xf32>
    %13 = vector.shape_cast %12 : vector<16x32xf32> to vector<2x8x32xf32>
    %14 = vector.extract_strided_slice %11 {offsets = [0, 32], sizes = [16, 32], strides = [1, 1]} : vector<16x96xf32> to vector<16x32xf32>
    %15 = vector.shape_cast %14 : vector<16x32xf32> to vector<2x8x32xf32>
    %16 = vector.extract_strided_slice %11 {offsets = [0, 64], sizes = [16, 32], strides = [1, 1]} : vector<16x96xf32> to vector<16x32xf32>
    %17 = vector.shape_cast %16 : vector<16x32xf32> to vector<2x8x32xf32>
    %18 = vector.extract_strided_slice %13 {offsets = [0, 0, 0], sizes = [2, 8, 8], strides = [1, 1, 1]} : vector<2x8x32xf32> to vector<2x8x8xf32>
    %19 = vector.extract_strided_slice %13 {offsets = [0, 0, 8], sizes = [2, 8, 8], strides = [1, 1, 1]} : vector<2x8x32xf32> to vector<2x8x8xf32>
    %20 = vector.extract_strided_slice %13 {offsets = [0, 0, 16], sizes = [2, 8, 8], strides = [1, 1, 1]} : vector<2x8x32xf32> to vector<2x8x8xf32>
    %21 = vector.extract_strided_slice %13 {offsets = [0, 0, 24], sizes = [2, 8, 8], strides = [1, 1, 1]} : vector<2x8x32xf32> to vector<2x8x8xf32>
    %22 = tpu.concatenate %18, %19, %20, %21 in 0 : vector<2x8x8xf32>, vector<2x8x8xf32>, vector<2x8x8xf32>, vector<2x8x8xf32> -> vector<8x8x8xf32>
    %23 = arith.truncf %22 : vector<8x8x8xf32> to vector<8x8x8xbf16>
    %24 = vector.extract_strided_slice %15 {offsets = [0, 0, 0], sizes = [2, 8, 8], strides = [1, 1, 1]} : vector<2x8x32xf32> to vector<2x8x8xf32>
    %25 = vector.extract_strided_slice %15 {offsets = [0, 0, 8], sizes = [2, 8, 8], strides = [1, 1, 1]} : vector<2x8x32xf32> to vector<2x8x8xf32>
    %26 = vector.extract_strided_slice %15 {offsets = [0, 0, 16], sizes = [2, 8, 8], strides = [1, 1, 1]} : vector<2x8x32xf32> to vector<2x8x8xf32>
    %27 = vector.extract_strided_slice %15 {offsets = [0, 0, 24], sizes = [2, 8, 8], strides = [1, 1, 1]} : vector<2x8x32xf32> to vector<2x8x8xf32>
    %28 = tpu.concatenate %24, %25, %26, %27 in 0 : vector<2x8x8xf32>, vector<2x8x8xf32>, vector<2x8x8xf32>, vector<2x8x8xf32> -> vector<8x8x8xf32>
    %29 = arith.truncf %28 : vector<8x8x8xf32> to vector<8x8x8xbf16>
    %30 = vector.extract_strided_slice %17 {offsets = [0, 0, 0], sizes = [2, 8, 8], strides = [1, 1, 1]} : vector<2x8x32xf32> to vector<2x8x8xf32>
    %31 = vector.extract_strided_slice %17 {offsets = [0, 0, 8], sizes = [2, 8, 8], strides = [1, 1, 1]} : vector<2x8x32xf32> to vector<2x8x8xf32>
    %32 = vector.extract_strided_slice %17 {offsets = [0, 0, 16], sizes = [2, 8, 8], strides = [1, 1, 1]} : vector<2x8x32xf32> to vector<2x8x8xf32>
    %33 = vector.extract_strided_slice %17 {offsets = [0, 0, 24], sizes = [2, 8, 8], strides = [1, 1, 1]} : vector<2x8x32xf32> to vector<2x8x8xf32>
    %34 = tpu.concatenate %30, %31, %32, %33 in 0 : vector<2x8x8xf32>, vector<2x8x8xf32>, vector<2x8x8xf32>, vector<2x8x8xf32> -> vector<8x8x8xf32>
    %35 = arith.truncf %34 : vector<8x8x8xf32> to vector<8x8x8xbf16>
    "tpu.trace_start"() <{level = 10 : i32, message = "gqd,gkd->gqk"}> : () -> ()
    %cst_8 = arith.constant dense<0.000000e+00> : vector<8x8x8xf32>
    %36 = tpu.matmul %23, %29, %cst_8 {dimension_numbers = #tpu.dot_dimension_numbers<[2], [2], [1], [1], [0, 0, 0, 1, 1, 1], [0], [0]>} : vector<8x8x8xbf16>, vector<8x8x8xbf16>, vector<8x8x8xf32> -> vector<8x8x8xf32>
    "tpu.trace_stop"() : () -> ()
    %cst_9 = arith.constant dense<0xFF800000> : vector<8x8xf32>
    %37 = vector.multi_reduction <maximumf>, %36, %cst_9 [2] : vector<8x8x8xf32> to vector<8x8xf32>
    %38 = vector.shape_cast %37 : vector<8x8xf32> to vector<8x8x1xf32>
    %39 = vector.broadcast %38 : vector<8x8x1xf32> to vector<8x8x8xf32>
    %40 = arith.subf %36, %39 : vector<8x8x8xf32>
    %41 = math.exp %40 : vector<8x8x8xf32>
    %cst_10 = arith.constant dense<0.000000e+00> : vector<8x8xf32>
    %42 = vector.multi_reduction <add>, %41, %cst_10 [2] : vector<8x8x8xf32> to vector<8x8xf32>
    %43 = vector.shape_cast %42 : vector<8x8xf32> to vector<8x8x1xf32>
    %44 = tpu.reciprocal %43 {approx = true} : vector<8x8x1xf32> -> vector<8x8x1xf32>
    %45 = vector.broadcast %44 : vector<8x8x1xf32> to vector<8x8x8xf32>
    %46 = arith.mulf %41, %45 : vector<8x8x8xf32>
    %47 = arith.truncf %46 : vector<8x8x8xf32> to vector<8x8x8xbf16>
    "tpu.trace_start"() <{level = 10 : i32, message = "gqk,gkd->gqd"}> : () -> ()
    %cst_11 = arith.constant dense<0.000000e+00> : vector<8x8x8xf32>
    %48 = tpu.matmul %47, %35, %cst_11 {dimension_numbers = #tpu.dot_dimension_numbers<[2], [1], [1], [2], [0, 0, 0, 1, 1, 2], [0], [0]>} : vector<8x8x8xbf16>, vector<8x8x8xbf16>, vector<8x8x8xf32> -> vector<8x8x8xf32>
    "tpu.trace_stop"() : () -> ()
    %49 = vector.extract_strided_slice %48 {offsets = [0, 0, 0], sizes = [2, 8, 8], strides = [1, 1, 1]} : vector<8x8x8xf32> to vector<2x8x8xf32>
    %50 = vector.extract_strided_slice %48 {offsets = [2, 0, 0], sizes = [2, 8, 8], strides = [1, 1, 1]} : vector<8x8x8xf32> to vector<2x8x8xf32>
    %51 = vector.extract_strided_slice %48 {offsets = [4, 0, 0], sizes = [2, 8, 8], strides = [1, 1, 1]} : vector<8x8x8xf32> to vector<2x8x8xf32>
    %52 = vector.extract_strided_slice %48 {offsets = [6, 0, 0], sizes = [2, 8, 8], strides = [1, 1, 1]} : vector<8x8x8xf32> to vector<2x8x8xf32>
    %53 = tpu.concatenate %49, %50, %51, %52 in 2 : vector<2x8x8xf32>, vector<2x8x8xf32>, vector<2x8x8xf32>, vector<2x8x8xf32> -> vector<2x8x32xf32>
    %54 = vector.shape_cast %53 : vector<2x8x32xf32> to vector<16x32xf32>
    %55 = arith.truncf %54 : vector<16x32xf32> to vector<16x32xbf16>
    %c0_12 = arith.constant 0 : index
    %c0_13 = arith.constant 0 : index
    %c0_14 = arith.constant 0 : index
    %56 = vector.load %arg8[%c0_12, %c0_13, %c0_14] : memref<1x32x32xbf16, #tpu.memory_space<vmem>>, vector<1x32x32xbf16>
    %57 = vector.shape_cast %56 : vector<1x32x32xbf16> to vector<32x32xbf16>
    %cst_15 = arith.constant dense<0.000000e+00> : vector<16x32xf32>
    %58 = tpu.matmul %55, %57, %cst_15 {dimension_numbers = #tpu.dot_dimension_numbers<[1], [0], [0], [1], [0, 0, 1, 1], [], []>} : vector<16x32xbf16>, vector<32x32xbf16>, vector<16x32xf32> -> vector<16x32xf32>
    %c0_16 = arith.constant 0 : index
    %c0_17 = arith.constant 0 : index
    %c0_18 = arith.constant 0 : index
    %59 = vector.load %arg9[%c0_16, %c0_17, %c0_18] : memref<1x1x32xf32, #tpu.memory_space<vmem>>, vector<1x1x32xf32>
    %60 = vector.shape_cast %59 : vector<1x1x32xf32> to vector<1x32xf32>
    %61 = vector.broadcast %60 : vector<1x32xf32> to vector<16x32xf32>
    %62 = arith.addf %58, %61 : vector<16x32xf32>
    %63 = arith.addf %3, %62 : vector<16x32xf32>
    %c0_19 = arith.constant 0 : index
    %c0_20 = arith.constant 0 : index
    %c0_21 = arith.constant 0 : index
    %64 = vector.load %arg10[%c0_19, %c0_20, %c0_21] : memref<1x2x32xf32, #tpu.memory_space<vmem>>, vector<1x2x32xf32>
    %65 = vector.shape_cast %64 : vector<1x2x32xf32> to vector<2x32xf32>
    %66 = vector.extract_strided_slice %65 {offsets = [0, 0], sizes = [1, 32], strides = [1, 1]} : vector<2x32xf32> to vector<1x32xf32>
    %67 = vector.extract_strided_slice %65 {offsets = [1, 0], sizes = [1, 32], strides = [1, 1]} : vector<2x32xf32> to vector<1x32xf32>
    %cst_22 = arith.constant dense<0.000000e+00> : vector<16xf32>
    %68 = vector.multi_reduction <add>, %63, %cst_22 [1] : vector<16x32xf32> to vector<16xf32>
    %69 = vector.shape_cast %68 : vector<16xf32> to vector<16x1xf32>
    %cst_23 = arith.constant 3.200000e+01 : f32
    %70 = vector.broadcast %cst_23 : f32 to vector<16x1xf32>
    %71 = arith.divf %69, %70 : vector<16x1xf32>
    %72 = vector.broadcast %71 : vector<16x1xf32> to vector<16x32xf32>
    %73 = arith.subf %63, %72 : vector<16x32xf32>
    %74 = arith.mulf %73, %73 : vector<16x32xf32>
    %cst_24 = arith.constant dense<0.000000e+00> : vector<16xf32>
    %75 = vector.multi_reduction <add>, %74, %cst_24 [1] : vector<16x32xf32> to vector<16xf32>
    %76 = vector.shape_cast %75 : vector<16xf32> to vector<16x1xf32>
    %cst_25 = arith.constant 3.200000e+01 : f32
    %77 = vector.broadcast %cst_25 : f32 to vector<16x1xf32>
    %78 = arith.divf %76, %77 : vector<16x1xf32>
    %79 = vector.broadcast %71 : vector<16x1xf32> to vector<16x32xf32>
    %80 = arith.subf %63, %79 : vector<16x32xf32>
    %cst_26 = arith.constant 9.99999974E-6 : f32
    %81 = vector.broadcast %cst_26 : f32 to vector<16x1xf32>
    %82 = arith.addf %78, %81 : vector<16x1xf32>
    %83 = math.rsqrt %82 : vector<16x1xf32>
    %84 = vector.broadcast %83 : vector<16x1xf32> to vector<16x32xf32>
    %85 = arith.mulf %80, %84 : vector<16x32xf32>
    %86 = vector.broadcast %66 : vector<1x32xf32> to vector<16x32xf32>
    %87 = arith.mulf %85, %86 : vector<16x32xf32>
    %88 = vector.broadcast %67 : vector<1x32xf32> to vector<16x32xf32>
    %89 = arith.addf %87, %88 : vector<16x32xf32>
    %90 = arith.truncf %89 : vector<16x32xf32> to vector<16x32xbf16>
    %c0_27 = arith.constant 0 : index
    %c0_28 = arith.constant 0 : index
    %c0_29 = arith.constant 0 : index
    %91 = vector.load %arg11[%c0_27, %c0_28, %c0_29] : memref<1x32x128xbf16, #tpu.memory_space<vmem>>, vector<1x32x128xbf16>
    %92 = vector.shape_cast %91 : vector<1x32x128xbf16> to vector<32x128xbf16>
    %cst_30 = arith.constant dense<0.000000e+00> : vector<16x128xf32>
    %93 = tpu.matmul %90, %92, %cst_30 {dimension_numbers = #tpu.dot_dimension_numbers<[1], [0], [0], [1], [0, 0, 1, 1], [], []>} : vector<16x32xbf16>, vector<32x128xbf16>, vector<16x128xf32> -> vector<16x128xf32>
    %c0_31 = arith.constant 0 : index
    %c0_32 = arith.constant 0 : index
    %c0_33 = arith.constant 0 : index
    %94 = vector.load %arg12[%c0_31, %c0_32, %c0_33] : memref<1x1x128xf32, #tpu.memory_space<vmem>>, vector<1x1x128xf32>
    %95 = vector.shape_cast %94 : vector<1x1x128xf32> to vector<1x128xf32>
    %96 = vector.broadcast %95 : vector<1x128xf32> to vector<16x128xf32>
    %97 = arith.addf %93, %96 : vector<16x128xf32>
    %cst_34 = arith.constant 0.000000e+00 : f32
    %98 = vector.broadcast %cst_34 : f32 to vector<16x128xf32>
    %99 = arith.maximumf %97, %98 : vector<16x128xf32>
    %100 = arith.truncf %99 : vector<16x128xf32> to vector<16x128xbf16>
    %c0_35 = arith.constant 0 : index
    %c0_36 = arith.constant 0 : index
    %c0_37 = arith.constant 0 : index
    %101 = vector.load %arg13[%c0_35, %c0_36, %c0_37] : memref<1x128x32xbf16, #tpu.memory_space<vmem>>, vector<1x128x32xbf16>
    %102 = vector.shape_cast %101 : vector<1x128x32xbf16> to vector<128x32xbf16>
    %cst_38 = arith.constant dense<0.000000e+00> : vector<16x32xf32>
    %103 = tpu.matmul %100, %102, %cst_38 {dimension_numbers = #tpu.dot_dimension_numbers<[1], [0], [0], [1], [0, 0, 1, 1], [], []>} : vector<16x128xbf16>, vector<128x32xbf16>, vector<16x32xf32> -> vector<16x32xf32>
    %c0_39 = arith.constant 0 : index
    %c0_40 = arith.constant 0 : index
    %c0_41 = arith.constant 0 : index
    %104 = vector.load %arg14[%c0_39, %c0_40, %c0_41] : memref<1x1x32xf32, #tpu.memory_space<vmem>>, vector<1x1x32xf32>
    %105 = vector.shape_cast %104 : vector<1x1x32xf32> to vector<1x32xf32>
    %106 = vector.broadcast %105 : vector<1x32xf32> to vector<16x32xf32>
    %107 = arith.addf %103, %106 : vector<16x32xf32>
    %108 = arith.addf %89, %107 : vector<16x32xf32>
    %c0_42 = arith.constant 0 : index
    %c0_43 = arith.constant 0 : index
    %c0_44 = arith.constant 0 : index
    %109 = vector.load %arg15[%c0_42, %c0_43, %c0_44] : memref<1x2x32xf32, #tpu.memory_space<vmem>>, vector<1x2x32xf32>
    %110 = vector.shape_cast %109 : vector<1x2x32xf32> to vector<2x32xf32>
    %111 = vector.extract_strided_slice %110 {offsets = [0, 0], sizes = [1, 32], strides = [1, 1]} : vector<2x32xf32> to vector<1x32xf32>
    %112 = vector.extract_strided_slice %110 {offsets = [1, 0], sizes = [1, 32], strides = [1, 1]} : vector<2x32xf32> to vector<1x32xf32>
    %cst_45 = arith.constant dense<0.000000e+00> : vector<16xf32>
    %113 = vector.multi_reduction <add>, %108, %cst_45 [1] : vector<16x32xf32> to vector<16xf32>
    %114 = vector.shape_cast %113 : vector<16xf32> to vector<16x1xf32>
    %cst_46 = arith.constant 3.200000e+01 : f32
    %115 = vector.broadcast %cst_46 : f32 to vector<16x1xf32>
    %116 = arith.divf %114, %115 : vector<16x1xf32>
    %117 = vector.broadcast %116 : vector<16x1xf32> to vector<16x32xf32>
    %118 = arith.subf %108, %117 : vector<16x32xf32>
    %119 = arith.mulf %118, %118 : vector<16x32xf32>
    %cst_47 = arith.constant dense<0.000000e+00> : vector<16xf32>
    %120 = vector.multi_reduction <add>, %119, %cst_47 [1] : vector<16x32xf32> to vector<16xf32>
    %121 = vector.shape_cast %120 : vector<16xf32> to vector<16x1xf32>
    %cst_48 = arith.constant 3.200000e+01 : f32
    %122 = vector.broadcast %cst_48 : f32 to vector<16x1xf32>
    %123 = arith.divf %121, %122 : vector<16x1xf32>
    %124 = vector.broadcast %116 : vector<16x1xf32> to vector<16x32xf32>
    %125 = arith.subf %108, %124 : vector<16x32xf32>
    %cst_49 = arith.constant 9.99999974E-6 : f32
    %126 = vector.broadcast %cst_49 : f32 to vector<16x1xf32>
    %127 = arith.addf %123, %126 : vector<16x1xf32>
    %128 = math.rsqrt %127 : vector<16x1xf32>
    %129 = vector.broadcast %128 : vector<16x1xf32> to vector<16x32xf32>
    %130 = arith.mulf %125, %129 : vector<16x32xf32>
    %131 = vector.broadcast %111 : vector<1x32xf32> to vector<16x32xf32>
    %132 = arith.mulf %130, %131 : vector<16x32xf32>
    %133 = vector.broadcast %112 : vector<1x32xf32> to vector<16x32xf32>
    %134 = arith.addf %132, %133 : vector<16x32xf32>
    %c0_50 = arith.constant 0 : index
    %c0_51 = arith.constant 0 : index
    %135 = vector.load %arg20[%c0_50, %c0_51] : memref<16x32xf32, #tpu.memory_space<vmem>>, vector<16x32xf32>
    tpu.vector_store %arg20[%c0_50, %c0_51], %134 {strides = array<i32>} : memref<16x32xf32, #tpu.memory_space<vmem>>, vector<16x32xf32>,
    %c1_i32 = arith.constant 1 : i32
    %136 = arith.cmpi eq, %arg1, %c1_i32 : i32
    %137 = arith.extui %136 : i1 to i32
    %c0_i32_52 = arith.constant 0 : i32
    %138 = arith.cmpi ne, %137, %c0_i32_52 : i32
    scf.if %138 {
      %c0_53 = arith.constant 0 : index
      %c0_54 = arith.constant 0 : index
      %139 = vector.load %arg16[%c0_53, %c0_54] : memref<2x32xf32, #tpu.memory_space<vmem>>, vector<2x32xf32>
      %140 = vector.extract_strided_slice %139 {offsets = [0, 0], sizes = [1, 32], strides = [1, 1]} : vector<2x32xf32> to vector<1x32xf32>
      %141 = vector.extract_strided_slice %139 {offsets = [1, 0], sizes = [1, 32], strides = [1, 1]} : vector<2x32xf32> to vector<1x32xf32>
      %cst_55 = arith.constant dense<0.000000e+00> : vector<16xf32>
      %142 = vector.multi_reduction <add>, %134, %cst_55 [1] : vector<16x32xf32> to vector<16xf32>
      %143 = vector.shape_cast %142 : vector<16xf32> to vector<16x1xf32>
      %cst_56 = arith.constant 3.200000e+01 : f32
      %144 = vector.broadcast %cst_56 : f32 to vector<16x1xf32>
      %145 = arith.divf %143, %144 : vector<16x1xf32>
      %146 = vector.broadcast %145 : vector<16x1xf32> to vector<16x32xf32>
      %147 = arith.subf %134, %146 : vector<16x32xf32>
      %148 = arith.mulf %147, %147 : vector<16x32xf32>
      %cst_57 = arith.constant dense<0.000000e+00> : vector<16xf32>
      %149 = vector.multi_reduction <add>, %148, %cst_57 [1] : vector<16x32xf32> to vector<16xf32>
      %150 = vector.shape_cast %149 : vector<16xf32> to vector<16x1xf32>
      %cst_58 = arith.constant 3.200000e+01 : f32
      %151 = vector.broadcast %cst_58 : f32 to vector<16x1xf32>
      %152 = arith.divf %150, %151 : vector<16x1xf32>
      %153 = vector.broadcast %145 : vector<16x1xf32> to vector<16x32xf32>
      %154 = arith.subf %134, %153 : vector<16x32xf32>
      %cst_59 = arith.constant 9.99999974E-6 : f32
      %155 = vector.broadcast %cst_59 : f32 to vector<16x1xf32>
      %156 = arith.addf %152, %155 : vector<16x1xf32>
      %157 = math.rsqrt %156 : vector<16x1xf32>
      %158 = vector.broadcast %157 : vector<16x1xf32> to vector<16x32xf32>
      %159 = arith.mulf %154, %158 : vector<16x32xf32>
      %160 = vector.broadcast %140 : vector<1x32xf32> to vector<16x32xf32>
      %161 = arith.mulf %159, %160 : vector<16x32xf32>
      %162 = vector.broadcast %141 : vector<1x32xf32> to vector<16x32xf32>
      %163 = arith.addf %161, %162 : vector<16x32xf32>
      %164 = arith.truncf %163 : vector<16x32xf32> to vector<16x32xbf16>
      %c0_60 = arith.constant 0 : index
      %c0_61 = arith.constant 0 : index
      %165 = vector.load %arg17[%c0_60, %c0_61] : memref<32x128xbf16, #tpu.memory_space<vmem>>, vector<32x128xbf16>
      %cst_62 = arith.constant dense<0.000000e+00> : vector<16x128xf32>
      %166 = tpu.matmul %164, %165, %cst_62 {dimension_numbers = #tpu.dot_dimension_numbers<[1], [0], [0], [1], [0, 0, 1, 1], [], []>} : vector<16x32xbf16>, vector<32x128xbf16>, vector<16x128xf32> -> vector<16x128xf32>
      %c0_63 = arith.constant 0 : index
      %c0_64 = arith.constant 0 : index
      %167 = vector.load %arg18[%c0_63, %c0_64] : memref<1x128xf32, #tpu.memory_space<vmem>>, vector<1x128xf32>
      %168 = vector.broadcast %167 : vector<1x128xf32> to vector<16x128xf32>
      %169 = arith.addf %166, %168 : vector<16x128xf32>
      %cst_65 = arith.constant 0.000000e+00 : f32
      %170 = vector.broadcast %cst_65 : f32 to vector<16x128xf32>
      %171 = arith.maximumf %169, %170 : vector<16x128xf32>
      %172 = vector.shape_cast %171 : vector<16x128xf32> to vector<2x8x128xf32>
      %c0_66 = arith.constant 0 : index
      %c0_67 = arith.constant 0 : index
      %c0_68 = arith.constant 0 : index
      %173 = vector.load %arg19[%c0_66, %c0_67, %c0_68] : memref<2x8x128xf32, #tpu.memory_space<vmem>>, vector<2x8x128xf32>
      tpu.vector_store %arg19[%c0_66, %c0_67, %c0_68], %172 {strides = array<i32>} : memref<2x8x128xf32, #tpu.memory_space<vmem>>, vector<2x8x128xf32>,
    } else {
    }
    return
  }
  func.func @transform_0(%arg0: i32, %arg1: i32) -> (i32, i32, i32) {
    %c0_i32 = arith.constant 0 : i32
    %c0_i32_0 = arith.constant 0 : i32
    %c0_i32_1 = arith.constant 0 : i32
    return %arg0, %c0_i32, %c0_i32_0 : i32, i32, i32
  }
  func.func @transform_1(%arg0: i32, %arg1: i32) -> (i32, i32) {
    %c0_i32 = arith.constant 0 : i32
    %c0_i32_0 = arith.constant 0 : i32
    %c0_i32_1 = arith.constant 0 : i32
    return %c0_i32, %c0_i32_0 : i32, i32
  }
  func.func @transform_2(%arg0: i32, %arg1: i32) -> (i32, i32) {
    %c0_i32 = arith.constant 0 : i32
    %c0_i32_0 = arith.constant 0 : i32
    %c0_i32_1 = arith.constant 0 : i32
    return %c0_i32, %c0_i32_0 : i32, i32
  }
  func.func @transform_3(%arg0: i32, %arg1: i32) -> (i32, i32) {
    %c0_i32 = arith.constant 0 : i32
    %c0_i32_0 = arith.constant 0 : i32
    %c0_i32_1 = arith.constant 0 : i32
    return %c0_i32, %c0_i32_0 : i32, i32
  }
  func.func @transform_4(%arg0: i32, %arg1: i32) -> (i32, i32, i32) {
    %c0_i32 = arith.constant 0 : i32
    %c0_i32_0 = arith.constant 0 : i32
    %c0_i32_1 = arith.constant 0 : i32
    return %arg1, %c0_i32, %c0_i32_0 : i32, i32, i32
  }
  func.func @transform_5(%arg0: i32, %arg1: i32) -> (i32, i32, i32) {
    %c0_i32 = arith.constant 0 : i32
    %c0_i32_0 = arith.constant 0 : i32
    %c0_i32_1 = arith.constant 0 : i32
    return %arg1, %c0_i32, %c0_i32_0 : i32, i32, i32
  }
  func.func @transform_6(%arg0: i32, %arg1: i32) -> (i32, i32, i32) {
    %c0_i32 = arith.constant 0 : i32
    %c0_i32_0 = arith.constant 0 : i32
    %c0_i32_1 = arith.constant 0 : i32
    return %arg1, %c0_i32, %c0_i32_0 : i32, i32, i32
  }
  func.func @transform_7(%arg0: i32, %arg1: i32) -> (i32, i32, i32) {
    %c0_i32 = arith.constant 0 : i32
    %c0_i32_0 = arith.constant 0 : i32
    %c0_i32_1 = arith.constant 0 : i32
    return %arg1, %c0_i32, %c0_i32_0 : i32, i32, i32
  }
  func.func @transform_8(%arg0: i32, %arg1: i32) -> (i32, i32, i32) {
    %c0_i32 = arith.constant 0 : i32
    %c0_i32_0 = arith.constant 0 : i32
    %c0_i32_1 = arith.constant 0 : i32
    return %arg1, %c0_i32, %c0_i32_0 : i32, i32, i32
  }
  func.func @transform_9(%arg0: i32, %arg1: i32) -> (i32, i32, i32) {
    %c0_i32 = arith.constant 0 : i32
    %c0_i32_0 = arith.constant 0 : i32
    %c0_i32_1 = arith.constant 0 : i32
    return %arg1, %c0_i32, %c0_i32_0 : i32, i32, i32
  }
  func.func @transform_10(%arg0: i32, %arg1: i32) -> (i32, i32, i32) {
    %c0_i32 = arith.constant 0 : i32
    %c0_i32_0 = arith.constant 0 : i32
    %c0_i32_1 = arith.constant 0 : i32
    return %arg1, %c0_i32, %c0_i32_0 : i32, i32, i32
  }
  func.func @transform_11(%arg0: i32, %arg1: i32) -> (i32, i32, i32) {
    %c0_i32 = arith.constant 0 : i32
    %c0_i32_0 = arith.constant 0 : i32
    %c0_i32_1 = arith.constant 0 : i32
    return %arg1, %c0_i32, %c0_i32_0 : i32, i32, i32
  }
  func.func @transform_12(%arg0: i32, %arg1: i32) -> (i32, i32, i32) {
    %c0_i32 = arith.constant 0 : i32
    %c0_i32_0 = arith.constant 0 : i32
    %c0_i32_1 = arith.constant 0 : i32
    return %arg1, %c0_i32, %c0_i32_0 : i32, i32, i32
  }
  func.func @transform_13(%arg0: i32, %arg1: i32) -> (i32, i32, i32) {
    %c0_i32 = arith.constant 0 : i32
    %c0_i32_0 = arith.constant 0 : i32
    %c0_i32_1 = arith.constant 0 : i32
    return %arg1, %c0_i32, %c0_i32_0 : i32, i32, i32
  }
  func.func @transform_14(%arg0: i32, %arg1: i32) -> (i32, i32) {
    %c0_i32 = arith.constant 0 : i32
    %c0_i32_0 = arith.constant 0 : i32
    %c0_i32_1 = arith.constant 0 : i32
    return %c0_i32, %c0_i32_0 : i32, i32
  }
  func.func @transform_15(%arg0: i32, %arg1: i32) -> (i32, i32) {
    %c0_i32 = arith.constant 0 : i32
    %c0_i32_0 = arith.constant 0 : i32
    %c0_i32_1 = arith.constant 0 : i32
    return %c0_i32, %c0_i32_0 : i32, i32
  }
  func.func @transform_16(%arg0: i32, %arg1: i32) -> (i32, i32) {
    %c0_i32 = arith.constant 0 : i32
    %c0_i32_0 = arith.constant 0 : i32
    %c0_i32_1 = arith.constant 0 : i32
    return %c0_i32, %c0_i32_0 : i32, i32
  }
  func.func @transform_17(%arg0: i32, %arg1: i32) -> (i32, i32, i32) {
    %c0_i32 = arith.constant 0 : i32
    %c0_i32_0 = arith.constant 0 : i32
    %c0_i32_1 = arith.constant 0 : i32
    return %arg0, %c0_i32, %c0_i32_0 : i32, i32, i32
  }
}

</mosaic_0001>

<bundles_post_ra>
// kernel: tpu_custom_call.1
= control target key start
LH: loop header
LB: loop body
LE: loop exit
PB: predicated region body
PF: predicated region fallthrough
CT: control target
= control target key end

     0   :  { %s2552_s0 = inlined_call_operand.vmem [shape: f32[2,8,8], index: 0, kind: input, shape index: {}]   ;;  %s2553_s1 = inlined_call_operand.vmem [shape: bf16[8,32], index: 1, kind: input, shape index: {}]   ;;  %s2554_s2 = inlined_call_operand.vmem [shape: f32[1,32], index: 2, kind: input, shape index: {}]   ;;  %s2555_s3 = inlined_call_operand.vmem [shape: f32[8,32], index: 3, kind: input, shape index: {}]   ;;  %s2556_s4 = inlined_call_operand.vmem [shape: bf16[2,32,96], index: 4, kind: input, shape index: {}]   ;;  %s2557_s5 = inlined_call_operand.vmem [shape: f32[2,1,96], index: 5, kind: input, shape index: {}]   ;;  %s2558_s6 = inlined_call_operand.vmem [shape: bf16[2,32,32], index: 6, kind: input, shape index: {}]   ;;  %s2559_s7 = inlined_call_operand.vmem [shape: f32[2,1,32], index: 7, kind: input, shape index: {}]   ;;  %s2560_s8 = inlined_call_operand.vmem [shape: f32[2,2,32], index: 8, kind: input, shape index: {}]   ;;  %s2561_s9 = inlined_call_operand.vmem [shape: bf16[2,32,128], index: 9, kind: input, shape index: {}]   ;;  %s2562_s10 = inlined_call_operand.vmem [shape: f32[2,1,128], index: 10, kind: input, shape index: {}]   ;;  %s2563_s11 = inlined_call_operand.vmem [shape: bf16[2,128,32], index: 11, kind: input, shape index: {}]   ;;  %s2564_s12 = inlined_call_operand.vmem [shape: f32[2,1,32], index: 12, kind: input, shape index: {}]   ;;  %s2565_s13 = inlined_call_operand.vmem [shape: f32[2,2,32], index: 13, kind: input, shape index: {}]   ;;  %s2566_s14 = inlined_call_operand.vmem [shape: f32[2,32], index: 14, kind: input, shape index: {}]   ;;  %s2567_s15 = inlined_call_operand.vmem [shape: bf16[32,128], index: 15, kind: input, shape index: {}]   ;;  %s2568_s16 = inlined_call_operand.vmem [shape: f32[1,128], index: 16, kind: input, shape index: {}]   ;;  %s2569_s17 = inlined_call_operand.hbm [shape: f32[2,8,128], index: 17, kind: output, shape index: {}]  }
   0x1   :  { %2574 = sst [smem:[#allocation9_spill]] %s2552_s0 }
   0x2   :  { %2575 = sst [smem:[#allocation10_spill]] %s2553_s1 }
   0x3   :  { %2576 = sst [smem:[#allocation11_spill]] %s2556_s4 }
   0x4   :  { %2577 = sst [smem:[#allocation12_spill]] %s2558_s6 }
   0x5   :  { %2578 = sst [smem:[#allocation13_spill]] %s2560_s8 }
   0x6   :  { %2579 = sst [smem:[#allocation14_spill]] %s2566_s14 }
   0x7   :  { %2580 = sst [smem:[#allocation15_spill]] %s2567_s15 }
   0x8   :  { %2581 = sst [smem:[#allocation16_spill]] %s2568_s16 }
   0x9   :  { %2582 = sst [smem:[#allocation17_spill]] %s2569_s17 }
   0xa   :  { %22 = vsyncpa [#allocation4], 0  ;;  %s2264_s24 = smov 0   ;;  %s2266_s25 = smov 0  }
   0xb   :  { %s2268_s26 = smov 0  }
   0xc LB: > { %2583 = sst [smem:[#allocation6_spill]] %s2157_s25  ;;  %s37_s28 = sadd.s32 1, %s2157_s25  ;;  %s2161_s26 = sphi %s2268_s26, %s28_s26   ;;  %s2157_s25 = sphi %s2266_s25, %s2601_s25   ;;  %s2153_s24 = sphi %s2264_s24, %s2600_s24  }
   0xd   : > { %2584 = sst [smem:[#allocation7_spill]] %s2161_s26  ;;  %p38_p0 = scmp.ge.s32.totalorder %s37_s28, 2 }
   0xe   : > { %p1877_p1 = scmp.ge.s32.totalorder %s2161_s26, 1  ;;  %p591_p2 = scmp.lt.s32.totalorder %s2161_s26, 3 }
   0xf   : > { %s2603_s28 = smov (%p38_p0, %s37_s28), 0 }
  0x10   : > { %2585 = sst [smem:[#allocation8_spill]] %s2603_s28  ;;  %p592_p3 = pnand %p1877_p1, %p591_p2 }
  0x11   : > { %p684_p4 = scmp.lt.s32.totalorder (!%p592_p3), %s2153_s24, 1  ;;  %s2586_s4 = sld [smem:[#allocation11_spill]] (!%p592_p3) }
  0x12   : > { %595 = sbr.rel (%p592_p3) target bundleno = 2632 (0xa48), region = 88  ;;  %s2587_s6 = sld [smem:[#allocation12_spill]] (!%p592_p3) }
  0x13   : > { %s2588_s8 = sld [smem:[#allocation13_spill]] (!%p592_p3)  ;;  %p1888_p5 = scmp.ne.s32.totalorder (!%p592_p3), %s2153_s24, 0 }
  0x17   : > { %s2287_s29 = scalar_select %p684_p4, %s2153_s24, 1 }
  0x18   : > { %s2589_s18 = sld [smem:[#allocation10_spill]] (!%p1888_p5) }
  0x19   : > { %s1979_s0 = sshll.u32 %s2287_s29, 4  ;;  %s1882_s26 = sshll.u32 %s2287_s29, 1 }
  0x1a   : > { %s2297_s21 = scalar_lea.vmem %s2586_s4, %s1979_s0  ;;  %s2302_s27 = scalar_lea.vmem %s2587_s6, %s1979_s0 }
  0x1b   : > { %s2312_s30 = scalar_lea.vmem %s2588_s8, %s1882_s26  ;;  %s2317_s1 = scalar_lea.vmem %s2561_s9, %s1979_s0 }
  0x1c   : > { %s711_s22 = scalar_lea.vmem %s2562_s10, %s2287_s29  ;;  %s1982_s23 = sshll.u32 %s2287_s29, 6 }
  0x1d   : > { %s2327_s25 = scalar_lea.vmem %s2563_s11, %s1982_s23  ;;  %s719_s14 = scalar_lea.vmem %s2564_s12, %s2287_s29 }
  0x1e   : > { %s2336_s19 = scalar_lea.vmem %s2565_s13, %s1882_s26  ;;  %729 = sbr.rel (%p1888_p5) target bundleno = 179 (0xb3), region = 92 }
  0x1f   : > { %s2590_s20 = sld [smem:[#allocation9_spill]] (!%p1888_p5) }
  0x23   : > { %v733_v0 = vld [vmem:[%s2589_s18] sm:$0xf]  ;;  %vm742_vm0 = vcmask 1043456   ;;  %vm738_vm1 = vcmask 64512   ;;  %vm763_vm2 = vcmask 261120  }
  0x24   : > { %v744_v3 = vsel %vm742_vm0, %v733_v0, 0  ;;  %v2040_v5 = vld [vmem:[%s2554_s2] ss:$0 sm:$0xff] }
  0x25   : > { %v730_v1 = vld [vmem:[%s2590_s20] sm:$0xff]  ;;  %v731_v2 = vld [vmem:[%s2590_s20 + $0x8] sm:$0xff]  ;;  %753 = vmatpush.bf16.msra.mxu0 %v744_v3 }
  0x26   : > { %v732_v4 = vpack.c.bf16 %v731_v2, %v730_v1  ;;  %v760_v7 = vld [vmem:[%s2555_s3] sm:$0xff] }
  0x28   : > { %1889 = vmatmul.msk.bf16.vlgmr.msra.gmra.mxu0 %vm738_vm1, %v732_v4 }
  0xa5   : > { %v755_v6 = vpop.f32.mrf.mxu0 }
  0xa6   : > { %v756_v8 = vadd.f32 %v2040_v5, %v755_v6 }
  0xa8   : > { %v761_v9 = vadd.f32 %v760_v7, %v756_v8 }
  0xaa   : > { %764 = vst.msk [vmem:[#allocation2] sm:$0xff] %vm763_vm2, %v761_v9 }
  0xad   : > { %v757_v10 = vpop.f32.mrf.mxu0 }
  0xae   : > { %v758_v11 = vadd.f32 %v2040_v5, %v757_v10 }
  0xb0   : > { %v762_v12 = vadd.f32 %v760_v7, %v758_v11 }
  0xb2   : > { %765 = vst.msk [vmem:[#allocation2 + $0x8] sm:$0xff] %vm763_vm2, %v762_v12 }
  0xb3 PF: > { %v1984_v13 = vld [vmem:[%s2297_s21 + $0x8] sm:$0xff]  ;;  %v1983_v14 = vld [vmem:[%s2297_s21] sm:$0xff]  ;;  %vm789_vm3 = vcmask 261120   ;;  %s2591_s18 = scalar_lea.vmem %s2557_s5, %s2287_s29  ;;  %s2163_s21 = smov 112   ;;  %vm840_vm4 = vcmask 64512   ;;  %vm1129_vm5 = vcmask 1043456  }
  0xb4   : > { %v2356_v15 = vld [vmem:[#allocation2] sm:$0xff]  ;;  %799 = vmatpush.bf16.msra.mxu0 %v1984_v13  ;;  %s2164_s6 = smov 120   ;;  %s2165_s15 = smov 104   ;;  %vm1319_vm6 = vcmask 130048   ;;  %vm1322_vm7 = vcmask 195584  }
  0xb5   : > { %v2056_v18 = vld [vmem:[%s2591_s18] ss:$0 sm:$0xff]  ;;  %s2166_s23 = smov 96   ;;  %s2167_s17 = smov 64  }
  0xb6   : > { %s2168_s8 = smov 8   ;;  %s2169_s26 = smov 16  }
  0xb7   : > { %s2170_s28 = smov 24   ;;  %s2592_s4 = scalar_lea.vmem %s2559_s7, %s2287_s29 }
  0xb8   : > { %800 = vmatpush.bf16.msra.mxu0 %v1983_v14  ;;  %p1965_p6 = scmp.ne.s32.totalorder %s2153_s24, 1 }
  0xb9   : > { %v2358_v16 = vld [vmem:[#allocation2 + $0x8] sm:$0xff] }
  0xba   : > { %v768_v17 = vpack.c.bf16 %v2358_v16, %v2356_v15 }
  0xbc   : > { %1898 = vmatmul.msk.bf16.vlgmr.msra.gmra.mxu0 %vm789_vm3, %v768_v17 }
 0x139   : > { %v802_v19 = vpop.f32.mrf.mxu0 }
 0x13a   : > { %v803_v20 = vadd.f32 %v2056_v18, %v802_v19 }
 0x13c   : > { %815 = vrot.lane.b32.xlu2 %v803_v20, %s2163_s21  ;;  %809 = vrot.lane.b32.xlu0 %v803_v20, %s2164_s6  ;;  %v827_v23 = vpack.c.bf16 %v803_v20, %v803_v20 }
 0x13e   : > { %v836_v25 = vunpack.c.l.b16 %v827_v23 }
 0x140   : > { %v837_v27 = vpack.c.b16 %v836_v25, %v836_v25 }
 0x141   : > { %v804_v21 = vpop.f32.mrf.mxu0 }
 0x142   : > { %v805_v22 = vadd.f32 %v2056_v18, %v804_v21 }
 0x144   : > { %817 = vrot.lane.b32.xlu1 %v805_v22, %s2163_s21  ;;  %823 = vrot.lane.b32.xlu2 %v805_v22, %s2165_s15  ;;  %v828_v24 = vpack.c.bf16 %v805_v22, %v805_v22 }
 0x145   : > { %811 = vrot.lane.b32.xlu0 %v805_v22, %s2164_s6  ;;  %s2594_s6 = sld [smem:[#allocation14_spill]] (!%p1965_p6) }
 0x146   : > { %v861_v26 = vunpack.c.l.b16 %v828_v24 }
 0x148   : > { %v862_v28 = vpack.c.b16 %v861_v26, %v861_v26 }
 0x14c   : > { %821 = vrot.lane.b32.xlu1 %v803_v20, %s2165_s15  ;;  %838 = vrot.lane.b32.xlu2 %v837_v27, %s2166_s23 }
 0x14d   : > { %863 = vrot.lane.b32.xlu0 %v862_v28, %s2166_s23 }
 0x196   : > { %v816_v29 = vpop.permute.xlu2 %815 }
 0x197   : > { %v831_v45 = vpack.c.bf16 %v816_v29, %v816_v29 }
 0x199   : > { %v933_v51 = vunpack.c.l.b16 %v831_v45 }
 0x19b   : > { %v2386_v56 = vpack.c.b16 %v933_v51, %v933_v51 }
 0x19e   : > { %v824_v30 = vpop.permute.xlu2 %823 }
 0x19f   : > { %v2373_v43 = vpack.c.bf16 %v824_v30, %v824_v30 }
 0x1a1   : > { %v1005_v48 = vunpack.c.l.b16 %v2373_v43 }
 0x1a3   : > { %v2382_v54 = vpack.c.b16 %v1005_v48, %v1005_v48 }
 0x1a6   : > { %v839_v31 = vpop.permute.xlu2 %838 }
 0x1a7   : > { %v845_v32 = vsel %vm840_vm4, %v839_v31, 0 }
 0x1a8   : > { %854 = vmatpush.bf16.xpose.msra.mxu1 %v845_v32 }
 0x1ae   : > { %v810_v33 = vpop.permute.xlu0 %809 }
 0x1af   : > { %v829_v34 = vpack.c.bf16 %v810_v33, %v810_v33  ;;  %1899 = vmatmul.msk.bf16.vlgmr.msra.gmra.mxu1 %vm840_vm4, %v827_v23 }
 0x1b1   : > { %v885_v35 = vunpack.c.l.b16 %v829_v34 }
 0x1b3   : > { %v886_v36 = vpack.c.b16 %v885_v35, %v885_v35 }
 0x1b5   : > { %887 = vrot.lane.b32.xlu1 %v886_v36, %s2166_s23 }
 0x1b6   : > { %v818_v37 = vpop.permute.xlu1 %817 }
 0x1b7   : > { %v832_v38 = vpack.c.bf16 %v818_v37, %v818_v37  ;;  %v812_v39 = vpop.permute.xlu0 %811 }
 0x1b8   : > { %v830_v40 = vpack.c.bf16 %v812_v39, %v812_v39 }
 0x1b9   : > { %v957_v41 = vunpack.c.l.b16 %v832_v38 }
 0x1ba   : > { %v909_v42 = vunpack.c.l.b16 %v830_v40 }
 0x1bb   : > { %v2375_v44 = vpack.c.b16 %v957_v41, %v957_v41 }
 0x1bc   : > { %v910_v46 = vpack.c.b16 %v909_v42, %v909_v42 }
 0x1bd   : > { %959 = vrot.lane.b32.xlu1 %v2375_v44, %s2166_s23 }
 0x1be   : > { %911 = vrot.lane.b32.xlu0 %v910_v46, %s2166_s23  ;;  %v822_v47 = vpop.permute.xlu1 %821 }
 0x1bf   : > { %v833_v49 = vpack.c.bf16 %v822_v47, %v822_v47  ;;  %v864_v50 = vpop.permute.xlu0 %863 }
 0x1c0   : > { %v869_v52 = vsel %vm840_vm4, %v864_v50, 0 }
 0x1c1   : > { %v981_v53 = vunpack.c.l.b16 %v833_v49  ;;  %878 = vmatpush.bf16.xpose.msra.mxu2 %v869_v52 }
 0x1c3   : > { %v2384_v55 = vpack.c.b16 %v981_v53, %v981_v53 }
 0x1c5   : > { %1007 = vrot.lane.b32.xlu1 %v2382_v54, %s2166_s23  ;;  %983 = vrot.lane.b32.xlu2 %v2384_v55, %s2166_s23 }
 0x1c6   : > { %935 = vrot.lane.b32.xlu0 %v2386_v56, %s2166_s23 }
 0x1c8   : > { %1900 = vmatmul.msk.bf16.vlgmr.msra.gmra.mxu2 %vm840_vm4, %v828_v24 }
 0x1cd   : > { %1146 = vrot.lane.b32.xlu1 %v862_v28, %s2167_s17  ;;  %1167 = vrot.lane.b32.xlu2 %v886_v36, %s2167_s17 }
 0x1ce   : > { %1124 = vrot.lane.b32.xlu0 %v837_v27, %s2167_s17 }
 0x21f   : > { %v984_v57 = vpop.permute.xlu2 %983 }
 0x220   : > { %v989_v60 = vsel %vm840_vm4, %v984_v57, 0 }
 0x227   : > { %v888_v58 = vpop.permute.xlu1 %887  ;;  %v1168_v62 = vpop.permute.xlu2 %1167 }
 0x228   : > { %v893_v59 = vsel %vm840_vm4, %v888_v58, 0  ;;  %v1173_v1 = vsel %vm1129_vm5, %v1168_v62, 0 }
 0x229   : > { %902 = vmatpush.bf16.xpose.msra.mxu3 %v893_v59 }
 0x22c   : > { %v856_v61 = vpop.f32.mrf.mxu1 }
 0x22d   : > { %v1028_v63 = vsel %vm840_vm4, %v856_v61, -inf }
 0x22e   : > { %1029 = vmax.xlane.f32.xlu1 %v1028_v63 }
 0x22f   : > { %v960_v0 = vpop.permute.xlu1 %959 }
 0x230   : > { %v912_v2 = vpop.permute.xlu0 %911  ;;  %1901 = vmatmul.msk.bf16.vlgmr.msra.gmra.mxu3 %vm840_vm4, %v829_v34  ;;  %v965_v3 = vsel %vm840_vm4, %v960_v0, 0 }
 0x231   : > { %998 = vmatpush.bf16.xpose.msrb.mxu3 %v989_v60  ;;  %v917_v4 = vsel %vm840_vm4, %v912_v2, 0  ;;  %974 = vmatpush.bf16.xpose.msrb.mxu2 %v965_v3 }
 0x232   : > { %926 = vmatpush.bf16.xpose.msrb.mxu0 %v917_v4 }
 0x234   : > { %v858_v5 = vpop.f32.mrf.mxu1 }
 0x237   : > { %v1008_v6 = vpop.permute.xlu1 %1007 }
 0x238   : > { %v1013_v7 = vsel %vm840_vm4, %v1008_v6, 0  ;;  %v936_v8 = vpop.permute.xlu0 %935  ;;  %1904 = vmatmul.msk.bf16.vlgmr.msrb.gmra.mxu2 %vm840_vm4, %v832_v38 }
 0x239   : > { %1182 = vmatpush.bf16.msra.mxu3 %v1173_v1  ;;  %1902 = vmatmul.msk.bf16.vlgmr.msrb.gmra.mxu0 %vm840_vm4, %v830_v40  ;;  %v941_v9 = vsel %vm840_vm4, %v936_v8, 0 }
 0x23a   : > { %950 = vmatpush.bf16.xpose.msrb.mxu1 %v941_v9  ;;  %1022 = vmatpush.bf16.xpose.msra.mxu0 %v1013_v7 }
 0x23f   : > { %v1147_v10 = vpop.permute.xlu1 %1146 }
 0x240   : > { %v1152_v11 = vsel %vm1129_vm5, %v1147_v10, 0  ;;  %v1125_v12 = vpop.permute.xlu0 %1124  ;;  %1905 = vmatmul.msk.bf16.vlgmr.msrb.gmra.mxu3 %vm840_vm4, %v833_v49 }
 0x241   : > { %v1131_v13 = vsel %vm1129_vm5, %v1125_v12, 0  ;;  %1903 = vmatmul.msk.bf16.vlgmr.msrb.gmra.mxu1 %vm840_vm4, %v831_v45  ;;  %1161 = vmatpush.bf16.msra.mxu2 %v1152_v11 }
 0x242   : > { %1140 = vmatpush.bf16.msra.mxu1 %v1131_v13 }
 0x247   : > { %1188 = vrot.lane.b32.xlu1 %v910_v46, %s2167_s17 }
 0x249   : > { %1906 = vmatmul.msk.bf16.vlgmr.msra.gmra.mxu0 %vm840_vm4, %v2373_v43 }
 0x24b   : > { %v880_v14 = vpop.f32.mrf.mxu2 }
 0x24c   : > { %v1031_v17 = vsel %vm840_vm4, %v880_v14, -inf }
 0x24d   : > { %1032 = vmax.xlane.f32.xlu2 %v1031_v17 }
 0x253   : > { %v882_v18 = vpop.f32.mrf.mxu2 }
 0x2a1   : > { %v1030_v19 = vpop.xlane.xlu1 %1029 }
 0x2a2   : > { %v1052_v20 = vsub.f32 %v856_v61, %v1030_v19 }
 0x2a4   : > { %v1060_v21 = vmul.f32 1.442695, %v1052_v20 }
 0x2a6   : > { %2060 = vpow2.f32 %v1060_v21 }
 0x2ac   : > { %v2061_v30 = vpop.eup %2060 }
 0x2ad   : > { %v1076_v33 = vsel %vm840_vm4, %v2061_v30, 0.0 }
 0x2b3   : > { %v904_v22 = vpop.f32.mrf.mxu3 }
 0x2b4   : > { %v1034_v23 = vsel %vm840_vm4, %v904_v22, -inf }
 0x2b5   : > { %1035 = vmax.xlane.f32.xlu0 %v1034_v23 }
 0x2b6   : > { %v928_v24 = vpop.f32.mrf.mxu0 }
 0x2b7   : > { %v1037_v25 = vsel %vm840_vm4, %v928_v24, -inf }
 0x2b8   : > { %1038 = vmax.xlane.f32.xlu2 %v1037_v25 }
 0x2b9   : > { %v1189_v26 = vpop.permute.xlu1 %1188 }
 0x2ba   : > { %v1194_v27 = vsel %vm1129_vm5, %v1189_v26, 0 }
 0x2bb   : > { %v906_v28 = vpop.f32.mrf.mxu3  ;;  %v976_v29 = vpop.f32.mrf.mxu2  ;;  %1203 = vmatpush.bf16.msrb.mxu0 %v1194_v27 }
 0x2bc   : > { %v1043_v43 = vsel %vm840_vm4, %v976_v29, -inf }
 0x2be   : > { %v930_v31 = vpop.f32.mrf.mxu0  ;;  %v952_v32 = vpop.f32.mrf.mxu1 }
 0x2bf   : > { %v1040_v34 = vsel %vm840_vm4, %v952_v32, -inf }
 0x2c0   : > { %1077 = vadd.xlane.f32.xlu2 %v1076_v33  ;;  %1041 = vmax.xlane.f32.xlu1 %v1040_v34  ;;  %v1033_v35 = vpop.xlane.xlu2 %1032 }
 0x2c1   : > { %v1053_v36 = vsub.f32 %v880_v14, %v1033_v35 }
 0x2c3   : > { %v1062_v37 = vmul.f32 1.442695, %v1053_v36  ;;  %v978_v38 = vpop.f32.mrf.mxu2  ;;  %v1000_v39 = vpop.f32.mrf.mxu3 }
 0x2c4   : > { %v1046_v40 = vsel %vm840_vm4, %v1000_v39, -inf }
 0x2c5   : > { %2062 = vpow2.f32 %v1062_v37  ;;  %1047 = vmax.xlane.f32.xlu0 %v1046_v40 }
 0x2c6   : > { %v954_v41 = vpop.f32.mrf.mxu1  ;;  %v1024_v42 = vpop.f32.mrf.mxu0 }
 0x2c7   : > { %v1049_v49 = vsel %vm840_vm4, %v1024_v42, -inf }
 0x2c8   : > { %1044 = vmax.xlane.f32.xlu2 %v1043_v43 }
 0x2cb   : > { %v2063_v45 = vpop.eup %2062  ;;  %v1002_v46 = vpop.f32.mrf.mxu3 }
 0x2cc   : > { %v1079_v47 = vsel %vm840_vm4, %v2063_v45, 0.0 }
 0x2cd   : > { %1080 = vadd.xlane.f32.xlu0 %v1079_v47 }
 0x2ce   : > { %v1026_v48 = vpop.f32.mrf.mxu0 }
 0x2d0   : > { %1050 = vmax.xlane.f32.xlu2 %v1049_v49 }
 0x2e8   : > { %1230 = vrot.lane.b32.xlu2 %v2375_v44, %s2167_s17 }
 0x328   : > { %v1036_v53 = vpop.xlane.xlu0 %1035 }
 0x329   : > { %v1054_v61 = vsub.f32 %v904_v22, %v1036_v53 }
 0x32b   : > { %v1039_v50 = vpop.xlane.xlu2 %1038  ;;  %v1064_v44 = vmul.f32 1.442695, %v1054_v61 }
 0x32c   : > { %v1055_v51 = vsub.f32 %v928_v24, %v1039_v50 }
 0x32e   : > { %v1066_v52 = vmul.f32 1.442695, %v1055_v51 }
 0x330   : > { %2064 = vpow2.f32 %v1066_v52 }
 0x333   : > { %v1042_v57 = vpop.xlane.xlu1 %1041  ;;  %v1078_v58 = vpop.xlane.xlu2 %1077 }
 0x334   : > { %v1056_v59 = vsub.f32 %v952_v32, %v1042_v57  ;;  %2066 = vrcp.f32 %v1078_v58 }
 0x336   : > { %v2065_v60 = vpop.eup %2064  ;;  %v1068_v62 = vmul.f32 1.442695, %v1056_v59 }
 0x337   : > { %v1085_v63 = vsel %vm840_vm4, %v2065_v60, 0.0 }
 0x338   : > { %2068 = vpow2.f32 %v1068_v62  ;;  %1086 = vadd.xlane.f32.xlu0 %v1085_v63  ;;  %v1048_v0 = vpop.xlane.xlu0 %1047 }
 0x339   : > { %v1058_v1 = vsub.f32 %v1000_v39, %v1048_v0 }
 0x33a   : > { %v2067_v2 = vpop.eup %2066 }
 0x33b   : > { %v1108_v3 = vmul.f32 %v2067_v2, %v2061_v30  ;;  %v1072_v4 = vmul.f32 1.442695, %v1058_v1  ;;  %v1045_v5 = vpop.xlane.xlu2 %1044 }
 0x33c   : > { %v1057_v6 = vsub.f32 %v976_v29, %v1045_v5 }
 0x33d   : > { %v1116_v7 = vpack.c.bf16 %v1108_v3, %v1108_v3  ;;  %2070 = vpow2.f32 %v1072_v4 }
 0x33e   : > { %v2429_v8 = vpop.eup %2068  ;;  %2072 = vpow2.f32 %v1064_v44  ;;  %v1070_v9 = vmul.f32 1.442695, %v1057_v6 }
 0x33f   : > { %1907 = vmatmul.msk.bf16.vlgmr.msra.gmra.mxu1 %vm840_vm4, %v1116_v7  ;;  %v1088_v10 = vsel %vm840_vm4, %v2429_v8, 0.0 }
 0x340   : > { %2074 = vpow2.f32 %v1070_v9  ;;  %1089 = vadd.xlane.f32.xlu1 %v1088_v10  ;;  %v1081_v11 = vpop.xlane.xlu0 %1080 }
 0x341   : > { %2076 = vrcp.f32 %v1081_v11 }
 0x343   : > { %v2071_v12 = vpop.eup %2070  ;;  %v1051_v13 = vpop.xlane.xlu2 %1050 }
 0x344   : > { %v2073_v14 = vpop.eup %2072  ;;  %v1059_v17 = vsub.f32 %v1024_v42, %v1051_v13  ;;  %v1094_v18 = vsel %vm840_vm4, %v2071_v12, 0.0 }
 0x345   : > { %1095 = vadd.xlane.f32.xlu2 %v1094_v18  ;;  %v1082_v22 = vsel %vm840_vm4, %v2073_v14, 0.0  ;;  %v1985_v18 = vld [vmem:[%s2302_s27] sm:$0xff] }
 0x346   : > { %v2075_v19 = vpop.eup %2074  ;;  %v1074_v20 = vmul.f32 1.442695, %v1059_v17  ;;  %v1986_v17 = vld [vmem:[%s2302_s27 + $0x8] sm:$0xff] }
 0x347   : > { %v2077_v21 = vpop.eup %2076  ;;  %v1091_v23 = vsel %vm840_vm4, %v2075_v19, 0.0 }
 0x348   : > { %v1109_v24 = vmul.f32 %v2077_v21, %v2063_v45  ;;  %2078 = vpow2.f32 %v1074_v20  ;;  %1083 = vadd.xlane.f32.xlu1 %v1082_v22  ;;  %1092 = vadd.xlane.f32.xlu0 %v1091_v23 }
 0x34a   : > { %v1117_v25 = vpack.c.bf16 %v1109_v24, %v1109_v24 }
 0x34b   : > { %v1231_v26 = vpop.permute.xlu2 %1230 }
 0x34c   : > { %v1236_v27 = vsel %vm1129_vm5, %v1231_v26, 0  ;;  %1908 = vmatmul.msk.bf16.vlgmr.msra.gmra.mxu2 %vm840_vm4, %v1117_v25 }
 0x34d   : > { %1245 = vmatpush.bf16.msrb.mxu2 %v1236_v27 }
 0x34e   : > { %v2079_v28 = vpop.eup %2078 }
 0x34f   : > { %v1097_v29 = vsel %vm840_vm4, %v2079_v28, 0.0 }
 0x350   : > { %1098 = vadd.xlane.f32.xlu0 %v1097_v29 }
 0x35d   : > { %1272 = vrot.lane.b32.xlu2 %v2382_v54, %s2167_s17 }
 0x361   : > { %1251 = vrot.lane.b32.xlu1 %v2384_v55, %s2167_s17 }
 0x364   : > { %1209 = vrot.lane.b32.xlu0 %v2386_v56, %s2167_s17  ;;  %s2595_s17 = sld [smem:[#allocation16_spill]] (!%p1965_p6) }
 0x3ab   : > { %v1087_v30 = vpop.xlane.xlu0 %1086 }
 0x3ac   : > { %2080 = vrcp.f32 %v1087_v30 }
 0x3b2   : > { %v2081_v31 = vpop.eup %2080 }
 0x3b3   : > { %v1111_v32 = vmul.f32 %v2081_v31, %v2065_v60  ;;  %v1090_v33 = vpop.xlane.xlu1 %1089 }
 0x3b5   : > { %v1119_v34 = vpack.c.bf16 %v1111_v32, %v1111_v32 }
 0x3b7   : > { %1910 = vmatmul.msk.bf16.vlgmr.msrb.gmra.mxu0 %vm840_vm4, %v1119_v34 }
 0x3b8   : > { %v1096_v35 = vpop.xlane.xlu2 %1095 }
 0x3bb   : > { %v1084_v36 = vpop.xlane.xlu1 %1083  ;;  %v1093_v37 = vpop.xlane.xlu0 %1092 }
 0x3bc   : > { %2082 = vrcp.f32 %v1084_v36  ;;  %v2447_v38 = vpop.f32.mrf.mxu1 }
 0x3bd   : > { %2084 = vrcp.f32 %v1093_v37 }
 0x3c0   : > { %v1273_v54 = vpop.permute.xlu2 %1272 }
 0x3c1   : > { %v1278_v55 = vsel %vm1129_vm5, %v1273_v54, 0 }
 0x3c2   : > { %v2083_v39 = vpop.eup %2082  ;;  %1287 = vmatpush.bf16.msra.mxu0 %v1278_v55 }
 0x3c3   : > { %v2085_v56 = vpop.eup %2084  ;;  %v1110_v40 = vmul.f32 %v2083_v39, %v2073_v14  ;;  %v1099_v41 = vpop.xlane.xlu0 %1098 }
 0x3c4   : > { %v1113_v42 = vmul.f32 %v2085_v56, %v2075_v19  ;;  %2086 = vrcp.f32 %v1099_v41  ;;  %v1144_v43 = vpop.f32.mrf.mxu1  ;;  %v2171_v41 = vmov 32.0  }
 0x3c5   : > { %v1118_v45 = vpack.c.bf16 %v1110_v40, %v1110_v40  ;;  %2088 = vrcp.f32 %v1096_v35  ;;  %v2057_v35 = vld [vmem:[%s2592_s4] ss:$0 sm:$0xff] }
 0x3c6   : > { %v1121_v46 = vpack.c.bf16 %v1113_v42, %v1113_v42  ;;  %2090 = vrcp.f32 %v1090_v33 }
 0x3c7   : > { %1909 = vmatmul.msk.bf16.vlgmr.msra.gmra.mxu3 %vm840_vm4, %v1118_v45  ;;  %2092 = vrcp.f32 %v2171_v41 }
 0x3c8   : > { %1912 = vmatmul.msk.bf16.vlgmr.msrb.gmra.mxu2 %vm840_vm4, %v1121_v46 }
 0x3ca   : > { %v2087_v47 = vpop.eup %2086 }
 0x3cb   : > { %v1115_v48 = vmul.f32 %v2087_v47, %v2079_v28  ;;  %v2089_v50 = vpop.eup %2088 }
 0x3cc   : > { %v2091_v52 = vpop.eup %2090  ;;  %v1114_v53 = vmul.f32 %v2089_v50, %v2071_v12 }
 0x3cd   : > { %v1123_v49 = vpack.c.bf16 %v1115_v48, %v1115_v48  ;;  %v1112_v59 = vmul.f32 %v2091_v52, %v2429_v8  ;;  %v2093_v42 = vpop.eup %2092 }
 0x3ce   : > { %v1122_v60 = vpack.c.bf16 %v1114_v53, %v1114_v53  ;;  %v1373_v43 = vmul.f32 32.0, %v2093_v42  ;;  %vm1377_vm8 = vweird.f32 %v2093_v42 }
 0x3cf   : > { %1914 = vmatmul.msk.bf16.vlgmr.msra.gmra.mxu0 %vm840_vm4, %v1123_v49  ;;  %v1163_v51 = vpop.f32.mrf.mxu2  ;;  %v1120_v0 = vpack.c.bf16 %v1112_v59, %v1112_v59 }
 0x3d0   : > { %v1374_v45 = vsub.f32 1.0, %v1373_v43 }
 0x3d2   : > { %v1375_v46 = vmul.f32 %v2093_v42, %v1374_v45 }
 0x3d3   : > { %v1252_v57 = vpop.permute.xlu1 %1251 }
 0x3d4   : > { %v1257_v58 = vsel %vm1129_vm5, %v1252_v57, 0  ;;  %v1376_v47 = vadd.f32 %v2093_v42, %v1375_v46 }
 0x3d5   : > { %1266 = vmatpush.bf16.msrb.mxu3 %v1257_v58 }
 0x3d6   : > { %v1210_v61 = vpop.permute.xlu0 %1209 }
 0x3d7   : > { %v1215_v62 = vsel %vm1129_vm5, %v1210_v61, 0  ;;  %v1165_v63 = vpop.f32.mrf.mxu2 }
 0x3d8   : > { %1224 = vmatpush.bf16.msrb.mxu1 %v1215_v62  ;;  %1913 = vmatmul.msk.bf16.vlgmr.msrb.gmra.mxu3 %vm840_vm4, %v1122_v60  ;;  %v1988_v60 = vld [vmem:[%s2317_s1 + $0x8] sm:$0xff] }
 0x3d9   : > { %1453 = vmatpush.bf16.msra.mxu2 %v1988_v60 }
 0x3db   : > { %1911 = vmatmul.msk.bf16.vlgmr.msrb.gmra.mxu1 %vm840_vm4, %v1120_v0  ;;  %v1987_v0 = vld [vmem:[%s2317_s1] sm:$0xff] }
 0x3dc   : > { %1355 = vmatpush.bf16.msra.mxu1 %v1986_v17 }
 0x3dd   : > { %1454 = vmatpush.bf16.msra.mxu2 %v1987_v0 }
 0x3e0   : > { %1356 = vmatpush.bf16.msra.mxu1 %v1985_v18  ;;  %v1365_v18 = vld [vmem:[%s2312_s30] sm:$0x3] }
 0x434   : > { %v1205_v1 = vpop.f32.mrf.mxu0 }
 0x43c   : > { %v1207_v2 = vpop.f32.mrf.mxu0 }
 0x44a   : > { %v1184_v44 = vpop.f32.mrf.mxu3 }
 0x44b   : > { %v2041_v3 = vpack.i.bf16 %v1205_v1, %v1184_v44  ;;  %v1247_v4 = vpop.f32.mrf.mxu2  ;;  %v1996_v1 = vld [vmem:[%s2327_s25 + $0x38] sm:$0xff] }
 0x44c   : > { %v1289_v5 = vpop.f32.mrf.mxu0  ;;  %1532 = vmatpush.bf16.msra.mxu3 %v1996_v1 }
 0x44d   : > { %2042 = vrot.lane.b32.xlu0 %v2041_v3, %s2168_s8  ;;  %v1995_v3 = vld [vmem:[%s2327_s25 + $0x30] sm:$0xff] }
 0x450   : > { %1533 = vmatpush.bf16.msra.mxu3 %v1995_v3 }
 0x452   : > { %v1186_v6 = vpop.f32.mrf.mxu3 }
 0x453   : > { %v1249_v7 = vpop.f32.mrf.mxu2 }
 0x454   : > { %v1291_v8 = vpop.f32.mrf.mxu0  ;;  %v1994_v7 = vld [vmem:[%s2327_s25 + $0x28] sm:$0xff] }
 0x455   : > { %1534 = vmatpush.bf16.msra.mxu3 %v1994_v7 }
 0x458   : > { %v1226_v9 = vpop.f32.mrf.mxu1 }
 0x459   : > { %v2046_v10 = vpack.i.bf16 %v1247_v4, %v1226_v9 }
 0x45b   : > { %2047 = vrot.lane.b32.xlu1 %v2046_v10, %s2169_s26  ;;  %v1268_v11 = vpop.f32.mrf.mxu3  ;;  %v1993_v10 = vld [vmem:[%s2327_s25 + $0x20] sm:$0xff] }
 0x45c   : > { %v2051_v12 = vpack.i.bf16 %v1289_v5, %v1268_v11  ;;  %1535 = vmatpush.bf16.msra.mxu3 %v1993_v10 }
 0x45e   : > { %2052 = vrot.lane.b32.xlu2 %v2051_v12, %s2170_s28 }
 0x460   : > { %v1228_v13 = vpop.f32.mrf.mxu1 }
 0x463   : > { %v1270_v14 = vpop.f32.mrf.mxu3 }
 0x4b8   : > { %v2053_v22 = vpop.permute.xlu2 %2052 }
 0x4b9   : > { %v2055_v26 = vunpack.i.h.bf16 %v2053_v22  ;;  %v2054_v27 = vunpack.i.l.bf16 %v2053_v22  ;;  %v1417_v22 = vperm.slane %v1365_v18, 0 }
 0x4bf   : > { %v2043_v19 = vpop.permute.xlu0 %2042 }
 0x4c0   : > { %v2045_v20 = vunpack.i.h.bf16 %v2043_v19  ;;  %v2044_v21 = vunpack.i.l.bf16 %v2043_v19 }
 0x4c2   : > { %v1318_v28 = vsel %vm840_vm4, %v1163_v51, %v2045_v20  ;;  %v1317_v29 = vsel %vm840_vm4, %v2447_v38, %v2044_v21 }
 0x4cd   : > { %v2048_v23 = vpop.permute.xlu1 %2047 }
 0x4ce   : > { %v2050_v24 = vunpack.i.h.bf16 %v2048_v23  ;;  %v2049_v25 = vunpack.i.l.bf16 %v2048_v23 }
 0x4d0   : > { %v1321_v30 = vsel %vm1319_vm6, %v1318_v28, %v2050_v24  ;;  %v1320_v31 = vsel %vm1319_vm6, %v1317_v29, %v2049_v25 }
 0x4d1   : > { %v1323_v32 = vsel %vm1322_vm7, %v1320_v31, %v2054_v27  ;;  %v1324_v33 = vsel %vm1322_vm7, %v1321_v30, %v2055_v26  ;;  %v1420_v26 = vperm.slane %v1365_v18, 1 }
 0x4d2   : > { %v1325_v34 = vpack.c.bf16 %v1324_v33, %v1323_v32  ;;  %v1992_v33 = vld [vmem:[%s2327_s25 + $0x18] sm:$0xff] }
 0x4d3   : > { %1536 = vmatpush.bf16.msra.mxu3 %v1992_v33 }
 0x4d4   : > { %1923 = vmatmul.msk.bf16.vlgmr.msra.gmra.mxu1 %vm789_vm3, %v1325_v34  ;;  %v1991_v34 = vld [vmem:[%s2327_s25 + $0x10] sm:$0xff] }
 0x4d7   : > { %1537 = vmatpush.bf16.msra.mxu3 %v1991_v34 }
 0x551   : > { %v1358_v36 = vpop.f32.mrf.mxu1 }
 0x552   : > { %v1359_v37 = vadd.f32 %v2057_v35, %v1358_v36  ;;  %v1989_v36 = vld [vmem:[%s2327_s25] sm:$0xff] }
 0x554   : > { %v1363_v54 = vadd.f32 %v1359_v37, %v2356_v15  ;;  %v2474_v15 = vsel %vm1377_vm8, %v2093_v42, %v1376_v47  ;;  %v2059_v42 = vld [vmem:[%s719_s14] ss:$0 sm:$0xff] }
 0x556   : > { %v1366_v55 = vsel %vm789_vm3, %v1363_v54, 0.0 }
 0x557   : > { %1367 = vadd.xlane.f32.xlu0 %v1366_v55 }
 0x559   : > { %v1360_v38 = vpop.f32.mrf.mxu1 }
 0x55a   : > { %v1361_v39 = vadd.f32 %v2057_v35, %v1360_v38  ;;  %v1990_v35 = vld [vmem:[%s2327_s25 + $0x8] sm:$0xff] }
 0x55b   : > { %1538 = vmatpush.bf16.msra.mxu3 %v1990_v35 }
 0x55c   : > { %v1364_v56 = vadd.f32 %v1361_v39, %v2358_v16 }
 0x55e   : > { %v1369_v40 = vsel %vm789_vm3, %v1364_v56, 0.0 }
 0x55f   : > { %1370 = vadd.xlane.f32.xlu1 %v1369_v40  ;;  %1539 = vmatpush.bf16.msra.mxu3 %v1989_v36 }
 0x5ca   : > { %v1368_v48 = vpop.xlane.xlu0 %1367 }
 0x5cb   : > { %v1379_v49 = vmul.f32 %v2474_v15, %v1368_v48 }
 0x5cd   : > { %v1381_v50 = vsub.f32 %v1363_v54, %v1379_v49  ;;  %v2058_v54 = vld [vmem:[%s711_s22] ss:$0 sm:$0xff]  ;;  %s2593_s22 = sld [smem:[#allocation15_spill]] (!%p1965_p6) }
 0x5cf   : > { %v1383_v16 = vmul.f32 %v1381_v50, %v1381_v50 }
 0x5d1   : > { %v1385_v51 = vsel %vm789_vm3, %v1383_v16, 0.0 }
 0x5d2   : > { %v1371_v52 = vpop.xlane.xlu1 %1370  ;;  %1386 = vadd.xlane.f32.xlu2 %v1385_v51 }
 0x5d3   : > { %v1380_v53 = vmul.f32 %v2474_v15, %v1371_v52 }
 0x5d5   : > { %v1382_v57 = vsub.f32 %v1364_v56, %v1380_v53 }
 0x5d7   : > { %v1384_v58 = vmul.f32 %v1382_v57, %v1382_v57 }
 0x5d9   : > { %v1388_v59 = vsel %vm789_vm3, %v1384_v58, 0.0 }
 0x5da   : > { %1389 = vadd.xlane.f32.xlu0 %v1388_v59 }
 0x645   : > { %v1387_v61 = vpop.xlane.xlu2 %1386 }
 0x646   : > { %v1391_v62 = vmul.f32 %v1387_v61, %v2474_v15 }
 0x648   : > { %v1393_v63 = vadd.f32 1e-05, %v1391_v62 }
 0x64a   : > { %2094 = vrsqrt.f32 %v1393_v63  ;;  %vm1401_vm10 = vweird.f32 %v1393_v63 }
 0x64d   : > { %v1390_v2 = vpop.xlane.xlu0 %1389 }
 0x64e   : > { %v1392_v44 = vmul.f32 %v1390_v2, %v2474_v15 }
 0x650   : > { %v2095_v4 = vpop.eup %2094  ;;  %v1394_v5 = vadd.f32 1e-05, %v1392_v44 }
 0x651   : > { %v1396_v6 = vmul.f32 %v2095_v4, %v1393_v63  ;;  %vm1402_vm9 = vweird.f32 %v2095_v4 }
 0x652   : > { %2096 = vrsqrt.f32 %v1394_v5  ;;  %vm1403_vm11 = vmor %vm1401_vm10, %vm1402_vm9  ;;  %vm1411_vm13 = vweird.f32 %v1394_v5 }
 0x653   : > { %v1397_v8 = vmul.f32 %v2095_v4, %v1396_v6 }
 0x655   : > { %v1398_v9 = vmul.f32 0.5, %v1397_v8 }
 0x657   : > { %v1399_v11 = vsub.f32 1.5, %v1398_v9  ;;  %v1548_v9 = vld [vmem:[%s2336_s19] sm:$0x3] }
 0x658   : > { %v2097_v12 = vpop.eup %2096 }
 0x659   : > { %v1400_v13 = vmul.f32 %v2095_v4, %v1399_v11  ;;  %v1406_v14 = vmul.f32 %v2097_v12, %v1394_v5  ;;  %vm1412_vm12 = vweird.f32 %v2097_v12 }
 0x65a   : > { %vm1413_vm14 = vmor %vm1411_vm13, %vm1412_vm12 }
 0x65b   : > { %v1407_v17 = vmul.f32 %v2097_v12, %v1406_v14  ;;  %v1404_v19 = vsel %vm1403_vm11, %v2095_v4, %v1400_v13  ;;  %v1593_v14 = vperm.slane %v1548_v9, 0 }
 0x65c   : > { %v1415_v23 = vmul.f32 %v1404_v19, %v1381_v50  ;;  %v1596_v19 = vperm.slane %v1548_v9, 1 }
 0x65d   : > { %v1408_v20 = vmul.f32 0.5, %v1407_v17 }
 0x65e   : > { %v1418_v27 = vmul.f32 %v1417_v22, %v1415_v23 }
 0x65f   : > { %v1409_v21 = vsub.f32 1.5, %v1408_v20 }
 0x660   : > { %v1421_v30 = vadd.f32 %v1420_v26, %v1418_v27 }
 0x661   : > { %v1410_v24 = vmul.f32 %v2097_v12, %v1409_v21 }
 0x663   : > { %v1414_v25 = vsel %vm1413_vm14, %v2097_v12, %v1410_v24 }
 0x664   : > { %v1416_v28 = vmul.f32 %v1414_v25, %v1382_v57 }
 0x666   : > { %v1419_v29 = vmul.f32 %v1417_v22, %v1416_v28 }
 0x668   : > { %v1422_v31 = vadd.f32 %v1420_v26, %v1419_v29 }
 0x66a   : > { %v1423_v32 = vpack.c.bf16 %v1422_v31, %v1421_v30 }
 0x66c   : > { %1932 = vmatmul.msk.bf16.vlgmr.msra.gmra.mxu2 %vm789_vm3, %v1423_v32 }
 0x6ef   : > { %v1456_v37 = vpop.f32.mrf.mxu2 }
 0x6f0   : > { %v1457_v55 = vadd.f32 %v2058_v54, %v1456_v37 }
 0x6f2   : > { %v1461_v56 = vmax.f32 %v1457_v55, 0.0 }
 0x6f7   : > { %v1458_v38 = vpop.f32.mrf.mxu2 }
 0x6f8   : > { %v1459_v39 = vadd.f32 %v2058_v54, %v1458_v38 }
 0x6fa   : > { %v1462_v40 = vmax.f32 %v1459_v39, 0.0 }
 0x6fc   : > { %v1463_v41 = vpack.c.bf16 %v1462_v40, %v1461_v56 }
 0x6fe   : > { %1540 = vmatmul.bf16.vlgmr.msra.gmra.mxu3 %v1463_v41 }
 0x781   : > { %v1541_v43 = vpop.f32.mrf.mxu3 }
 0x782   : > { %v1542_v45 = vadd.f32 %v2059_v42, %v1541_v43 }
 0x784   : > { %v1546_v46 = vadd.f32 %v1542_v45, %v1421_v30 }
 0x786   : > { %v1549_v47 = vsel %vm789_vm3, %v1546_v46, 0.0 }
 0x787   : > { %1550 = vadd.xlane.f32.xlu1 %v1549_v47 }
 0x789   : > { %v1543_v48 = vpop.f32.mrf.mxu3 }
 0x78a   : > { %v1544_v49 = vadd.f32 %v2059_v42, %v1543_v48 }
 0x78c   : > { %v1547_v50 = vadd.f32 %v1544_v49, %v1422_v31 }
 0x78e   : > { %v1552_v16 = vsel %vm789_vm3, %v1547_v50, 0.0 }
 0x78f   : > { %1553 = vadd.xlane.f32.xlu2 %v1552_v16 }
 0x7fa   : > { %v1551_v51 = vpop.xlane.xlu1 %1550 }
 0x7fb   : > { %v1555_v52 = vmul.f32 %v1551_v51, %v2474_v15 }
 0x7fd   : > { %v1557_v53 = vsub.f32 %v1546_v46, %v1555_v52 }
 0x7ff   : > { %v1559_v57 = vmul.f32 %v1557_v53, %v1557_v53 }
 0x801   : > { %v1561_v58 = vsel %vm789_vm3, %v1559_v57, 0.0 }
 0x802   : > { %v1554_v59 = vpop.xlane.xlu2 %1553  ;;  %1562 = vadd.xlane.f32.xlu0 %v1561_v58 }
 0x803   : > { %v1556_v60 = vmul.f32 %v1554_v59, %v2474_v15 }
 0x805   : > { %v1558_v61 = vsub.f32 %v1547_v50, %v1556_v60 }
 0x807   : > { %v1560_v62 = vmul.f32 %v1558_v61, %v1558_v61 }
 0x809   : > { %v1564_v63 = vsel %vm789_vm3, %v1560_v62, 0.0 }
 0x80a   : > { %1565 = vadd.xlane.f32.xlu1 %v1564_v63 }
 0x875   : > { %v1563_v0 = vpop.xlane.xlu0 %1562 }
 0x876   : > { %v1567_v1 = vmul.f32 %v1563_v0, %v2474_v15 }
 0x878   : > { %v1569_v2 = vadd.f32 1e-05, %v1567_v1 }
 0x87a   : > { %2098 = vrsqrt.f32 %v1569_v2  ;;  %vm1577_vm0 = vweird.f32 %v1569_v2 }
 0x87d   : > { %v1566_v44 = vpop.xlane.xlu1 %1565 }
 0x87e   : > { %v1568_v3 = vmul.f32 %v1566_v44, %v2474_v15 }
 0x880   : > { %v2099_v4 = vpop.eup %2098  ;;  %v1570_v5 = vadd.f32 1e-05, %v1568_v3 }
 0x881   : > { %v1572_v6 = vmul.f32 %v2099_v4, %v1569_v2  ;;  %vm1578_vm15 = vweird.f32 %v2099_v4 }
 0x882   : > { %2100 = vrsqrt.f32 %v1570_v5  ;;  %vm1579_vm1 = vmor %vm1577_vm0, %vm1578_vm15  ;;  %vm1587_vm4 = vweird.f32 %v1570_v5 }
 0x883   : > { %v1573_v7 = vmul.f32 %v2099_v4, %v1572_v6 }
 0x885   : > { %v1574_v8 = vmul.f32 0.5, %v1573_v7 }
 0x887   : > { %v1575_v10 = vsub.f32 1.5, %v1574_v8 }
 0x888   : > { %v2101_v11 = vpop.eup %2100 }
 0x889   : > { %v1576_v12 = vmul.f32 %v2099_v4, %v1575_v10  ;;  %v1582_v13 = vmul.f32 %v2101_v11, %v1570_v5  ;;  %vm1588_vm2 = vweird.f32 %v2101_v11 }
 0x88a   : > { %vm1589_vm5 = vmor %vm1587_vm4, %vm1588_vm2 }
 0x88b   : > { %v1580_v17 = vsel %vm1579_vm1, %v2099_v4, %v1576_v12  ;;  %v1583_v18 = vmul.f32 %v2101_v11, %v1582_v13 }
 0x88c   : > { %v1591_v20 = vmul.f32 %v1580_v17, %v1557_v53 }
 0x88d   : > { %v1584_v21 = vmul.f32 0.5, %v1583_v18 }
 0x88e   : > { %v1594_v22 = vmul.f32 %v1593_v14, %v1591_v20 }
 0x88f   : > { %v1585_v23 = vsub.f32 1.5, %v1584_v21 }
 0x890   : > { %v1597_v24 = vadd.f32 %v1596_v19, %v1594_v22 }
 0x891   : > { %v1586_v25 = vmul.f32 %v2101_v11, %v1585_v23 }
 0x892   : > { %1599 = vst.msk [vmem:[#allocation2] sm:$0xff] %vm789_vm3, %v1597_v24 }
 0x893   : > { %v1590_v26 = vsel %vm1589_vm5, %v2101_v11, %v1586_v25 }
 0x894   : > { %v1592_v27 = vmul.f32 %v1590_v26, %v1558_v61 }
 0x896   : > { %v1595_v28 = vmul.f32 %v1593_v14, %v1592_v27  ;;  %1604 = sbr.rel (%p1965_p6) target bundleno = 2620 (0xa3c), region = 96 }
 0x898   : > { %v1598_v29 = vadd.f32 %v1596_v19, %v1595_v28 }
 0x89a   : > { %1600 = vst.msk [vmem:[#allocation2 + $0x8] sm:$0xff] %vm789_vm3, %v1598_v29 }
 0x89b   : > { %v1606_v30 = vsel %vm789_vm3, %v1597_v24, 0.0  ;;  %v1609_v31 = vsel %vm789_vm3, %v1598_v29, 0.0  ;;  %v1998_v56 = vld [vmem:[%s2593_s22 + $0x8] sm:$0xff]  ;;  %v1997_v41 = vld [vmem:[%s2593_s22] sm:$0xff] }
 0x89c   : > { %1607 = vadd.xlane.f32.xlu0 %v1606_v30  ;;  %1686 = vmatpush.bf16.msra.mxu0 %v1998_v56  ;;  %v1605_v60 = vld [vmem:[%s2594_s6] sm:$0x3] }
 0x89d   : > { %v1650_v63 = vperm.slane %v1605_v60, 0  ;;  %v1653_v3 = vperm.slane %v1605_v60, 1  ;;  %v2102_v8 = vld [vmem:[%s2595_s17] ss:$0 sm:$0xff] }
 0x8a0   : > { %1687 = vmatpush.bf16.msra.mxu0 %v1997_v41 }
 0x8a4   : > { %1610 = vadd.xlane.f32.xlu0 %v1609_v31 }
 0x90f   : > { %v1608_v32 = vpop.xlane.xlu0 %1607 }
 0x910   : > { %v1612_v33 = vmul.f32 %v1608_v32, %v2474_v15 }
 0x912   : > { %v1614_v34 = vsub.f32 %v1597_v24, %v1612_v33 }
 0x914   : > { %v1616_v35 = vmul.f32 %v1614_v34, %v1614_v34 }
 0x916   : > { %v1618_v36 = vsel %vm789_vm3, %v1616_v35, 0.0 }
 0x917   : > { %1619 = vadd.xlane.f32.xlu1 %v1618_v36  ;;  %v1611_v37 = vpop.xlane.xlu0 %1610 }
 0x918   : > { %v1613_v54 = vmul.f32 %v1611_v37, %v2474_v15 }
 0x91a   : > { %v1615_v55 = vsub.f32 %v1598_v29, %v1613_v54 }
 0x91c   : > { %v1617_v38 = vmul.f32 %v1615_v55, %v1615_v55 }
 0x91e   : > { %v1621_v39 = vsel %vm789_vm3, %v1617_v38, 0.0 }
 0x91f   : > { %1622 = vadd.xlane.f32.xlu1 %v1621_v39 }
 0x98a   : > { %v1620_v40 = vpop.xlane.xlu1 %1619 }
 0x98b   : > { %v1624_v42 = vmul.f32 %v1620_v40, %v2474_v15 }
 0x98d   : > { %v1626_v43 = vadd.f32 1e-05, %v1624_v42 }
 0x98f   : > { %2103 = vrsqrt.f32 %v1626_v43  ;;  %vm1634_vm7 = vweird.f32 %v1626_v43 }
 0x992   : > { %v1623_v45 = vpop.xlane.xlu1 %1622 }
 0x993   : > { %v1625_v46 = vmul.f32 %v1623_v45, %v2474_v15 }
 0x995   : > { %v2104_v47 = vpop.eup %2103  ;;  %v1627_v48 = vadd.f32 1e-05, %v1625_v46 }
 0x996   : > { %v1629_v49 = vmul.f32 %v2104_v47, %v1626_v43  ;;  %vm1635_vm6 = vweird.f32 %v2104_v47 }
 0x997   : > { %2105 = vrsqrt.f32 %v1627_v48  ;;  %vm1636_vm8 = vmor %vm1634_vm7, %vm1635_vm6  ;;  %vm1644_vm10 = vweird.f32 %v1627_v48 }
 0x998   : > { %v1630_v50 = vmul.f32 %v2104_v47, %v1629_v49 }
 0x99a   : > { %v1631_v16 = vmul.f32 0.5, %v1630_v50 }
 0x99c   : > { %v1632_v51 = vsub.f32 1.5, %v1631_v16 }
 0x99d   : > { %v2106_v52 = vpop.eup %2105 }
 0x99e   : > { %v1633_v53 = vmul.f32 %v2104_v47, %v1632_v51  ;;  %v1639_v57 = vmul.f32 %v2106_v52, %v1627_v48  ;;  %vm1645_vm9 = vweird.f32 %v2106_v52 }
 0x99f   : > { %vm1646_vm11 = vmor %vm1644_vm10, %vm1645_vm9 }
 0x9a0   : > { %v1640_v58 = vmul.f32 %v2106_v52, %v1639_v57  ;;  %v1637_v15 = vsel %vm1636_vm8, %v2104_v47, %v1633_v53 }
 0x9a1   : > { %v1648_v62 = vmul.f32 %v1637_v15, %v1614_v34 }
 0x9a2   : > { %v1641_v59 = vmul.f32 0.5, %v1640_v58 }
 0x9a3   : > { %v1651_v44 = vmul.f32 %v1650_v63, %v1648_v62 }
 0x9a4   : > { %v1642_v61 = vsub.f32 1.5, %v1641_v59 }
 0x9a5   : > { %v1654_v5 = vadd.f32 %v1653_v3, %v1651_v44 }
 0x9a6   : > { %v1643_v0 = vmul.f32 %v2106_v52, %v1642_v61 }
 0x9a8   : > { %v1647_v1 = vsel %vm1646_vm11, %v2106_v52, %v1643_v0 }
 0x9a9   : > { %v1649_v2 = vmul.f32 %v1647_v1, %v1615_v55 }
 0x9ab   : > { %v1652_v4 = vmul.f32 %v1650_v63, %v1649_v2 }
 0x9ad   : > { %v1655_v6 = vadd.f32 %v1653_v3, %v1652_v4 }
 0x9af   : > { %v1656_v7 = vpack.c.bf16 %v1655_v6, %v1654_v5 }
 0x9b1   : > { %1974 = vmatmul.msk.bf16.vlgmr.msra.gmra.mxu0 %vm789_vm3, %v1656_v7 }
 0xa2e   : > { %v1689_v9 = vpop.f32.mrf.mxu0 }
 0xa2f   : > { %v1690_v10 = vadd.f32 %v2102_v8, %v1689_v9 }
 0xa31   : > { %v1694_v11 = vmax.f32 %v1690_v10, 0.0 }
 0xa33   : > { %1696 = vst [vmem:[#allocation3] sm:$0xff] %v1694_v11 }
 0xa36   : > { %v1691_v12 = vpop.f32.mrf.mxu0 }
 0xa37   : > { %v1692_v13 = vadd.f32 %v2102_v8, %v1691_v12 }
 0xa39   : > { %v1695_v14 = vmax.f32 %v1692_v13, 0.0 }
 0xa3b   : > { %1697 = vst [vmem:[#allocation3 + $0x8] sm:$0xff] %v1695_v14 }
 0xa3c PF: > { %s2596_s26 = sld [smem:[#allocation7_spill]]  ;;  %s2172_s1 = smov [#allocation3]  }
 0xa3d   : > { %s2598_s4 = sld [smem:[#allocation17_spill]]  ;;  %s1706_s0 = sshll.u32 %s2172_s1, 4  ;;  %s1707_s0 = int_to_ptr.vmem [resolvable:$true] %s1706_s0 }
 0xa3e   : > { %s2173_s18 = smov 128  }
 0xa42   : > { %s2597_s28 = sadd.s32 4294967295, %s2596_s26  }
 0xa43   : > { %p2003_p7 = scmp.eq.s32.totalorder %s2597_s28, 1  ;;  %s1708_s30 = sshll.u32 %s2598_s4, 4  ;;  %s1709_s30 = int_to_ptr.hbm [resolvable:$true] %s1708_s30 }
 0xa45   : > { %2000 = dma.vmem_to_hbm [thread:$0]  (%p2003_p7), %s1707_s0, 256, %s1709_s30, [#allocation4], %s2173_s18, %s2173_s18, %s2168_s8  }
 0xa46   : > { %2148 = dma.done.wait (%p2003_p7), [#allocation4], 256  }
 0xa47   : > { %2150 = vsyncadd (%p2003_p7), [#allocation4], 4294967040 }
 0xa48 PF: > { %s2599_s24 = sld [smem:[#allocation7_spill]] }
 0xa49   : > { %s2601_s25 = sld [smem:[#allocation8_spill]] }
 0xa4e   : > { %s28_s26 = sadd.s32 1, %s2599_s24   ;;  %s2600_s24 = sld [smem:[#allocation6_spill]] }
 0xa4f   : > { %p25_p8 = scmp.ge.s32.totalorder %s28_s26, 4  }
 0xa51   :  { %27 = sbr.rel (!%p25_p8) target bundleno = 12 (0xc), region = 154 }
 0xa56   :  { %1725 = vsyncpa [#allocation4], 1 }
 0xa57   :  { %1727 = vsyncpa [#allocation4 + $0x1], 1 }

</bundles_post_ra>
